<compile_context>
chip_gen: v7x
topology: tpu7x:2x2x1
jax: 0.10.0
libtpu: 0.0.40
codegen_flags: <defaults>
</compile_context>

<pallas_src>
import numpy as np
import jax
import jax.numpy as jnp
from jax.experimental import pallas as pl
from jax.experimental.pallas import tpu as pltpu

_BN_EPS = 1e-5


# ----------------------------------------------------------------------------
# Fused forward kernel (one grid step = one batch tile, everything in VMEM)
# ----------------------------------------------------------------------------
def _net_fwd_kernel(x_ref, w1e_ref, w1o_ref, w2e_ref, w2o_ref,
                    b1_ref, b2_ref, wf1_ref, bf1_ref, wf2_ref, bf2_ref,
                    o_ref,
                    h1_ref, p1_ref, h2_ref):
    f32 = jnp.float32
    tb = x_ref.shape[0]

    # ---- conv1 (5x5, 1->10, BN1 folded) as band-matrix MXU matmuls ---------
    # acc_*[b*24+i, jp*10+c] = conv1(x)[b, i, col=2*jp(+1), c]
    acc_e = jnp.zeros((tb * 24, 120), f32)
    acc_o = jnp.zeros((tb * 24, 120), f32)
    for kh in range(5):
        lhs = x_ref[:, kh:kh + 24, :].reshape(tb * 24, 28)
        acc_e = acc_e + jnp.dot(lhs, w1e_ref[kh], preferred_element_type=f32)
        acc_o = acc_o + jnp.dot(lhs, w1o_ref[kh], preferred_element_type=f32)
    # 2x2 max-pool: columns are the even/odd accumulators (elementwise max) ...
    colp1 = jnp.maximum(acc_e, acc_o).reshape(tb, 24, 120)
    h1_ref[...] = colp1
    # ... rows via stride-2 sublane reads from VMEM; bias + ReLU afterwards
    # (per-channel bias commutes with max-pool; ReLU then BN shift == 0).
    rowp1 = jnp.maximum(h1_ref[:, pl.ds(0, 12, stride=2), :],
                        h1_ref[:, pl.ds(1, 12, stride=2), :])      # (tb,12,120)
    p1_ref[...] = jnp.maximum(rowp1 + b1_ref[...], 0.0)           # lanes jw*10+c

    # ---- conv2 (5x5, 10->20, BN2 folded); dropout2d = identity in eval -----
    acc2e = jnp.zeros((tb * 8, 80), f32)
    acc2o = jnp.zeros((tb * 8, 80), f32)
    for kh in range(5):
        lhs2 = p1_ref[:, kh:kh + 8, :].reshape(tb * 8, 120)
        acc2e = acc2e + jnp.dot(lhs2, w2e_ref[kh], preferred_element_type=f32)
        acc2o = acc2o + jnp.dot(lhs2, w2o_ref[kh], preferred_element_type=f32)
    colp2 = jnp.maximum(acc2e, acc2o).reshape(tb, 8, 80)
    h2_ref[...] = colp2
    rowp2 = jnp.maximum(h2_ref[:, pl.ds(0, 4, stride=2), :],
                        h2_ref[:, pl.ds(1, 4, stride=2), :])       # (tb,4,80)
    p2 = jnp.maximum(rowp2 + b2_ref[...], 0.0)                     # lanes jp*20+co

    # ---- flatten (NHWC order; fc1 rows pre-permuted) + fc1 + ReLU + fc2 ----
    hid = bf1_ref[...]
    for i in range(4):                                 # 4 row-chunks of 80 feats
        hid = hid + jnp.dot(p2[:, i, :], wf1_ref[i], preferred_element_type=f32)
    hid = jnp.maximum(hid, 0.0)        # (tb,50); F.dropout is identity in eval
    z = jnp.dot(hid, wf2_ref[...], preferred_element_type=f32) + bf2_ref[...]

    m = jnp.max(z, axis=-1, keepdims=True)
    s = z - m
    lse = jnp.log(jnp.sum(jnp.exp(s), axis=-1, keepdims=True))
    o_ref[...] = (s - lse).astype(o_ref.dtype)


# ----------------------------------------------------------------------------
# Parameters (PyTorch-equivalent init / layouts) and kernel-layout prep
# ----------------------------------------------------------------------------
def init_params(key):
    k = jax.random.split(key, 4)
    # Conv2d: kaiming_normal_(fan_out, relu): std = sqrt(2 / (cout*kh*kw)).
    # Stored HWIO (kh, kw, cin, cout); permute OIHW->(2,3,1,0) to import torch weights.
    w1 = jax.random.normal(k[0], (5, 5, 1, 10), jnp.float32) * np.sqrt(2.0 / (10 * 25))
    b1 = jnp.zeros((10,), jnp.float32)
    w2 = jax.random.normal(k[1], (5, 5, 10, 20), jnp.float32) * np.sqrt(2.0 / (20 * 25))
    b2 = jnp.zeros((20,), jnp.float32)
    # Linear: xavier_normal_, bias 0.  Stored (in, out); fc1 input index is in
    # PyTorch's NCHW flatten order (c*16 + h*4 + w).
    wf1 = jax.random.normal(k[2], (320, 50), jnp.float32) * np.sqrt(2.0 / (320 + 50))
    bf1 = jnp.zeros((50,), jnp.float32)
    wf2 = jax.random.normal(k[3], (50, 10), jnp.float32) * np.sqrt(2.0 / (50 + 10))
    bf2 = jnp.zeros((10,), jnp.float32)
    # BatchNorm2d(affine=True) fresh eval state: gamma=1, beta=0, mean=0, var=1.
    return dict(
        w1=w1, b1=b1, w2=w2, b2=b2, wf1=wf1, bf1=bf1, wf2=wf2, bf2=bf2,
        bn1_gamma=jnp.ones((10,), jnp.float32), bn1_beta=jnp.zeros((10,), jnp.float32),
        bn1_mean=jnp.zeros((10,), jnp.float32), bn1_var=jnp.ones((10,), jnp.float32),
        bn2_gamma=jnp.ones((20,), jnp.float32), bn2_beta=jnp.zeros((20,), jnp.float32),
        bn2_mean=jnp.zeros((20,), jnp.float32), bn2_var=jnp.ones((20,), jnp.float32),
    )


# Kernel flattens pooled activations in (h, w, c) order; PyTorch's view(-1, 320)
# flattens in (c, h, w) order -> permute fc1 weight rows accordingly.
_FC1_PERM = np.array([c * 16 + h * 4 + w
                      for h in range(4) for w in range(4) for c in range(20)])

_HP = jax.lax.Precision.HIGHEST


def _prepare_kernel_params(p):
    # bn(relu(maxpool(conv(x)))) with scale = gamma/sqrt(var+eps) > 0 commutes:
    #   = relu(maxpool(conv_{w*scale}(x) + b*scale)) + (beta - mean*scale)
    # The additive term is exactly 0 for this module's eval-mode state, so it
    # is dropped.
    # TODO(synk): if real trained BN stats with a nonzero shift are loaded, add
    # the shift back after the in-kernel ReLU.
    s1 = p["bn1_gamma"] * jax.lax.rsqrt(p["bn1_var"] + _BN_EPS)
    s2 = p["bn2_gamma"] * jax.lax.rsqrt(p["bn2_var"] + _BN_EPS)
    w1f = (p["w1"] * s1)[:, :, 0, :]              # (5,5,10)   [kh, kw, c]
    b1f = p["b1"] * s1                            # (10,)
    w2f = p["w2"] * s2                            # (5,5,10,20)[kh, kw, c, co]
    b2f = p["b2"] * s2                            # (20,)

    kw_i = np.arange(5)[:, None, None]
    # conv1 bands: W1x[kh, j_in, jp*10+c] = w1f[kh, j_in-(2*jp(+1)), c]
    jin_i = np.arange(28)[None, :, None]
    jp1_i = np.arange(12)[None, None, :]
    se1_e = (jin_i == 2 * jp1_i + kw_i).astype(np.float32)       # (5,28,12)
    se1_o = (jin_i == 2 * jp1_i + 1 + kw_i).astype(np.float32)
    w1e = jnp.einsum("hwc,wjp->hjpc", w1f, se1_e, precision=_HP).reshape(5, 28, 120)
    w1o = jnp.einsum("hwc,wjp->hjpc", w1f, se1_o, precision=_HP).reshape(5, 28, 120)

    # conv2 bands: W2x[kh, jw*10+c, jp*20+co] = w2f[kh, jw-(2*jp(+1)), c, co]
    jw_i = np.arange(12)[None, :, None]
    jp2_i = np.arange(4)[None, None, :]
    se2_e = (jw_i == 2 * jp2_i + kw_i).astype(np.float32)        # (5,12,4)
    se2_o = (jw_i == 2 * jp2_i + 1 + kw_i).astype(np.float32)
    w2e = jnp.einsum("hwcd,wjp->hjcpd", w2f, se2_e, precision=_HP).reshape(5, 120, 80)
    w2o = jnp.einsum("hwcd,wjp->hjcpd", w2f, se2_o, precision=_HP).reshape(5, 120, 80)

    b1t = jnp.tile(b1f, 12).reshape(1, 120)       # lane layout jw*10 + c
    b2t = jnp.tile(b2f, 4).reshape(1, 80)         # lane layout jp*20 + co

    wf1k = p["wf1"][_FC1_PERM, :].reshape(4, 80, 50)   # NHWC-flatten rows, by h
    bf1k = p["bf1"].reshape(1, 50)
    wf2k = p["wf2"]
    bf2k = p["bf2"].reshape(1, 10)
    return w1e, w1o, w2e, w2o, b1t, b2t, wf1k, bf1k, wf2k, bf2k


def forward(params, x_nchw, *, batch_tile=32):
    """MNIST Net forward (eval mode).  x: (B, 1, 28, 28) NCHW -> (B, 10)."""
    B = x_nchw.shape[0]
    assert x_nchw.shape[1:] == (1, 28, 28), x_nchw.shape
    # cin == 1, so NCHW -> (B, 28, 28) is a pure reshape (no data movement).
    x = x_nchw.astype(jnp.float32).reshape(B, 28, 28)

    tb = min(batch_tile, B)
    n_tiles = -(-B // tb)
    Bp = n_tiles * tb
    if Bp != B:
        x = jnp.pad(x, ((0, Bp - B), (0, 0), (0, 0)))

    w1e, w1o, w2e, w2o, b1t, b2t, wf1k, bf1k, wf2k, bf2k = _prepare_kernel_params(params)

    def wspec(*shape):
        return pl.BlockSpec(shape, lambda b, _n=len(shape): (0,) * _n)

    out = pl.pallas_call(
        _net_fwd_kernel,
        out_shape=jax.ShapeDtypeStruct((Bp, 10), jnp.float32),
        grid=(n_tiles,),
        in_specs=[
            pl.BlockSpec((tb, 28, 28), lambda b: (b, 0, 0)),
            wspec(5, 28, 120), wspec(5, 28, 120),
            wspec(5, 120, 80), wspec(5, 120, 80),
            wspec(1, 120), wspec(1, 80),
            wspec(4, 80, 50), wspec(1, 50),
            wspec(50, 10), wspec(1, 10),
        ],
        out_specs=pl.BlockSpec((tb, 10), lambda b: (b, 0)),
        scratch_shapes=[
            pltpu.VMEM((tb, 24, 120), jnp.float32),   # column-pooled conv1
            pltpu.VMEM((tb, 12, 120), jnp.float32),   # layer-1 output (p1)
            pltpu.VMEM((tb, 8, 80), jnp.float32),     # column-pooled conv2
        ],
        compiler_params=pltpu.CompilerParams(
            dimension_semantics=("parallel",),
            vmem_limit_bytes=32 * 1024 * 1024,
        ),
    )(x, w1e, w1o, w2e, w2o, b1t, b2t, wf1k, bf1k, wf2k, bf2k)
    return out[:B]


# ----------------------------------------------------------------------------
# Pure-JAX reference (same eval-mode semantics as the PyTorch module)
# ----------------------------------------------------------------------------
def _reference_forward(params, x_nchw):
    p = params
    x = x_nchw.astype(jnp.float32)
    s1 = p["bn1_gamma"] * jax.lax.rsqrt(p["bn1_var"] + _BN_EPS)
    t1 = p["bn1_beta"] - p["bn1_mean"] * s1
    s2 = p["bn2_gamma"] * jax.lax.rsqrt(p["bn2_var"] + _BN_EPS)
    t2 = p["bn2_beta"] - p["bn2_mean"] * s2

    def conv(y, w_hwio, b):
        w = jnp.transpose(w_hwio, (3, 2, 0, 1))           # HWIO -> OIHW
        y = jax.lax.conv_general_dilated(
            y, w, (1, 1), "VALID",
            dimension_numbers=("NCHW", "OIHW", "NCHW"), precision=_HP)
        return y + b[None, :, None, None]

    def pool2(y):
        b, c, h, w = y.shape
        return y.reshape(b, c, h // 2, 2, w // 2, 2).max(axis=(3, 5))

    y = conv(x, p["w1"], p["b1"])
    y = jnp.maximum(pool2(y), 0.0) * s1[None, :, None, None] + t1[None, :, None, None]
    y = conv(y, p["w2"], p["b2"])                         # dropout2d: identity (eval)
    y = jnp.maximum(pool2(y), 0.0) * s2[None, :, None, None] + t2[None, :, None, None]
    y = y.reshape(y.shape[0], -1)                         # NCHW flatten (c, h, w)
    y = jnp.maximum(jnp.dot(y, p["wf1"], precision=_HP) + p["bf1"], 0.0)
    z = jnp.dot(y, p["wf2"], precision=_HP) + p["bf2"]    # dropout: identity (eval)
    return jax.nn.log_softmax(z, axis=-1)


if __name__ == "__main__":
    key = jax.random.PRNGKey(0)
    pkey, xkey = jax.random.split(key)
    params = init_params(pkey)
    # MNIST-shaped input (batch=2); 28x28 is required by x.view(-1, 320).
    x = jax.random.normal(xkey, (2, 1, 28, 28), jnp.float32)

    out = jax.jit(forward)(params, x)
    out = jax.block_until_ready(out)

    assert out.shape == (2, 10), out.shape
    assert bool(jnp.all(jnp.isfinite(out)))
    # log_softmax rows must exponentiate to ~1
    assert bool(jnp.allclose(jnp.sum(jnp.exp(out), axis=-1), 1.0, atol=1e-4))
    # match the pure-JAX reference (loose tol: MXU vs XLA-conv rounding paths)
    ref = _reference_forward(params, x)
    err = float(jnp.max(jnp.abs(out - ref)))
    assert err < 5e-2, f"mismatch vs reference: {err}"
    print("KERNEL_OK")
</pallas_src>

<mosaic_0001>
module attributes {stable_mosaic.version = 11 : i64} {
  func.func @_net_fwd_kernel(%arg0: i32, %arg1: memref<2x28x28xf32, #tpu.memory_space<vmem>>, %arg2: memref<5x28x120xf32, #tpu.memory_space<vmem>>, %arg3: memref<5x28x120xf32, #tpu.memory_space<vmem>>, %arg4: memref<5x120x80xf32, #tpu.memory_space<vmem>>, %arg5: memref<5x120x80xf32, #tpu.memory_space<vmem>>, %arg6: memref<1x120xf32, #tpu.memory_space<vmem>>, %arg7: memref<1x80xf32, #tpu.memory_space<vmem>>, %arg8: memref<4x80x50xf32, #tpu.memory_space<vmem>>, %arg9: memref<1x50xf32, #tpu.memory_space<vmem>>, %arg10: memref<50x10xf32, #tpu.memory_space<vmem>>, %arg11: memref<1x10xf32, #tpu.memory_space<vmem>>, %arg12: memref<2x10xf32, #tpu.memory_space<vmem>>, %arg13: memref<2x24x120xf32, #tpu.memory_space<vmem>>, %arg14: memref<2x12x120xf32, #tpu.memory_space<vmem>>, %arg15: memref<2x8x80xf32, #tpu.memory_space<vmem>>) attributes {dimension_semantics = [#tpu.dimension_semantics<parallel>], iteration_bounds = array<i64: 1>, scalar_prefetch = 0 : i64, scratch_operands = 3 : i64, tpu.core_type = #tpu.core_type<tc>, window_params = [{transform_indices = @transform_0, window_bounds = array<i64: 2, 28, 28>}, {pipeline_mode = #tpu.pipeline_mode<synchronous>, transform_indices = @transform_1, window_bounds = array<i64: 5, 28, 120>}, {pipeline_mode = #tpu.pipeline_mode<synchronous>, transform_indices = @transform_2, window_bounds = array<i64: 5, 28, 120>}, {pipeline_mode = #tpu.pipeline_mode<synchronous>, transform_indices = @transform_3, window_bounds = array<i64: 5, 120, 80>}, {pipeline_mode = #tpu.pipeline_mode<synchronous>, transform_indices = @transform_4, window_bounds = array<i64: 5, 120, 80>}, {pipeline_mode = #tpu.pipeline_mode<synchronous>, transform_indices = @transform_5, window_bounds = array<i64: 1, 120>}, {pipeline_mode = #tpu.pipeline_mode<synchronous>, transform_indices = @transform_6, window_bounds = array<i64: 1, 80>}, {pipeline_mode = #tpu.pipeline_mode<synchronous>, transform_indices = @transform_7, window_bounds = array<i64: 4, 80, 50>}, {pipeline_mode = #tpu.pipeline_mode<synchronous>, transform_indices = @transform_8, window_bounds = array<i64: 1, 50>}, {pipeline_mode = #tpu.pipeline_mode<synchronous>, transform_indices = @transform_9, window_bounds = array<i64: 50, 10>}, {pipeline_mode = #tpu.pipeline_mode<synchronous>, transform_indices = @transform_10, window_bounds = array<i64: 1, 10>}, {transform_indices = @transform_11, window_bounds = array<i64: 2, 10>}]} {
    %cst = arith.constant 0.000000e+00 : f32
    %0 = vector.broadcast %cst : f32 to vector<48x120xf32>
    %cst_0 = arith.constant 0.000000e+00 : f32
    %1 = vector.broadcast %cst_0 : f32 to vector<48x120xf32>
    %c0 = arith.constant 0 : index
    %c0_1 = arith.constant 0 : index
    %c0_2 = arith.constant 0 : index
    %2 = vector.load %arg1[%c0, %c0_1, %c0_2] : memref<2x28x28xf32, #tpu.memory_space<vmem>>, vector<2x24x28xf32>
    %3 = vector.shape_cast %2 : vector<2x24x28xf32> to vector<48x28xf32>
    %c0_3 = arith.constant 0 : index
    %c0_4 = arith.constant 0 : index
    %c0_5 = arith.constant 0 : index
    %4 = vector.load %arg2[%c0_3, %c0_4, %c0_5] : memref<5x28x120xf32, #tpu.memory_space<vmem>>, vector<1x28x120xf32>
    %5 = vector.shape_cast %4 : vector<1x28x120xf32> to vector<28x120xf32>
    %cst_6 = arith.constant dense<0.000000e+00> : vector<48x120xf32>
    %6 = tpu.matmul %3, %5, %cst_6 {dimension_numbers = #tpu.dot_dimension_numbers<[1], [0], [0], [1], [0, 0, 1, 1], [], []>} : vector<48x28xf32>, vector<28x120xf32>, vector<48x120xf32> -> vector<48x120xf32>
    %7 = arith.addf %0, %6 : vector<48x120xf32>
    %c0_7 = arith.constant 0 : index
    %c0_8 = arith.constant 0 : index
    %c0_9 = arith.constant 0 : index
    %8 = vector.load %arg3[%c0_7, %c0_8, %c0_9] : memref<5x28x120xf32, #tpu.memory_space<vmem>>, vector<1x28x120xf32>
    %9 = vector.shape_cast %8 : vector<1x28x120xf32> to vector<28x120xf32>
    %cst_10 = arith.constant dense<0.000000e+00> : vector<48x120xf32>
    %10 = tpu.matmul %3, %9, %cst_10 {dimension_numbers = #tpu.dot_dimension_numbers<[1], [0], [0], [1], [0, 0, 1, 1], [], []>} : vector<48x28xf32>, vector<28x120xf32>, vector<48x120xf32> -> vector<48x120xf32>
    %11 = arith.addf %1, %10 : vector<48x120xf32>
    %c0_11 = arith.constant 0 : index
    %c1 = arith.constant 1 : index
    %c0_12 = arith.constant 0 : index
    %12 = vector.load %arg1[%c0_11, %c1, %c0_12] : memref<2x28x28xf32, #tpu.memory_space<vmem>>, vector<2x24x28xf32>
    %13 = vector.shape_cast %12 : vector<2x24x28xf32> to vector<48x28xf32>
    %c1_13 = arith.constant 1 : index
    %c0_14 = arith.constant 0 : index
    %c0_15 = arith.constant 0 : index
    %14 = vector.load %arg2[%c1_13, %c0_14, %c0_15] : memref<5x28x120xf32, #tpu.memory_space<vmem>>, vector<1x28x120xf32>
    %15 = vector.shape_cast %14 : vector<1x28x120xf32> to vector<28x120xf32>
    %cst_16 = arith.constant dense<0.000000e+00> : vector<48x120xf32>
    %16 = tpu.matmul %13, %15, %cst_16 {dimension_numbers = #tpu.dot_dimension_numbers<[1], [0], [0], [1], [0, 0, 1, 1], [], []>} : vector<48x28xf32>, vector<28x120xf32>, vector<48x120xf32> -> vector<48x120xf32>
    %17 = arith.addf %7, %16 : vector<48x120xf32>
    %c1_17 = arith.constant 1 : index
    %c0_18 = arith.constant 0 : index
    %c0_19 = arith.constant 0 : index
    %18 = vector.load %arg3[%c1_17, %c0_18, %c0_19] : memref<5x28x120xf32, #tpu.memory_space<vmem>>, vector<1x28x120xf32>
    %19 = vector.shape_cast %18 : vector<1x28x120xf32> to vector<28x120xf32>
    %cst_20 = arith.constant dense<0.000000e+00> : vector<48x120xf32>
    %20 = tpu.matmul %13, %19, %cst_20 {dimension_numbers = #tpu.dot_dimension_numbers<[1], [0], [0], [1], [0, 0, 1, 1], [], []>} : vector<48x28xf32>, vector<28x120xf32>, vector<48x120xf32> -> vector<48x120xf32>
    %21 = arith.addf %11, %20 : vector<48x120xf32>
    %c0_21 = arith.constant 0 : index
    %c2 = arith.constant 2 : index
    %c0_22 = arith.constant 0 : index
    %22 = vector.load %arg1[%c0_21, %c2, %c0_22] : memref<2x28x28xf32, #tpu.memory_space<vmem>>, vector<2x24x28xf32>
    %23 = vector.shape_cast %22 : vector<2x24x28xf32> to vector<48x28xf32>
    %c2_23 = arith.constant 2 : index
    %c0_24 = arith.constant 0 : index
    %c0_25 = arith.constant 0 : index
    %24 = vector.load %arg2[%c2_23, %c0_24, %c0_25] : memref<5x28x120xf32, #tpu.memory_space<vmem>>, vector<1x28x120xf32>
    %25 = vector.shape_cast %24 : vector<1x28x120xf32> to vector<28x120xf32>
    %cst_26 = arith.constant dense<0.000000e+00> : vector<48x120xf32>
    %26 = tpu.matmul %23, %25, %cst_26 {dimension_numbers = #tpu.dot_dimension_numbers<[1], [0], [0], [1], [0, 0, 1, 1], [], []>} : vector<48x28xf32>, vector<28x120xf32>, vector<48x120xf32> -> vector<48x120xf32>
    %27 = arith.addf %17, %26 : vector<48x120xf32>
    %c2_27 = arith.constant 2 : index
    %c0_28 = arith.constant 0 : index
    %c0_29 = arith.constant 0 : index
    %28 = vector.load %arg3[%c2_27, %c0_28, %c0_29] : memref<5x28x120xf32, #tpu.memory_space<vmem>>, vector<1x28x120xf32>
    %29 = vector.shape_cast %28 : vector<1x28x120xf32> to vector<28x120xf32>
    %cst_30 = arith.constant dense<0.000000e+00> : vector<48x120xf32>
    %30 = tpu.matmul %23, %29, %cst_30 {dimension_numbers = #tpu.dot_dimension_numbers<[1], [0], [0], [1], [0, 0, 1, 1], [], []>} : vector<48x28xf32>, vector<28x120xf32>, vector<48x120xf32> -> vector<48x120xf32>
    %31 = arith.addf %21, %30 : vector<48x120xf32>
    %c0_31 = arith.constant 0 : index
    %c3 = arith.constant 3 : index
    %c0_32 = arith.constant 0 : index
    %32 = vector.load %arg1[%c0_31, %c3, %c0_32] : memref<2x28x28xf32, #tpu.memory_space<vmem>>, vector<2x24x28xf32>
    %33 = vector.shape_cast %32 : vector<2x24x28xf32> to vector<48x28xf32>
    %c3_33 = arith.constant 3 : index
    %c0_34 = arith.constant 0 : index
    %c0_35 = arith.constant 0 : index
    %34 = vector.load %arg2[%c3_33, %c0_34, %c0_35] : memref<5x28x120xf32, #tpu.memory_space<vmem>>, vector<1x28x120xf32>
    %35 = vector.shape_cast %34 : vector<1x28x120xf32> to vector<28x120xf32>
    %cst_36 = arith.constant dense<0.000000e+00> : vector<48x120xf32>
    %36 = tpu.matmul %33, %35, %cst_36 {dimension_numbers = #tpu.dot_dimension_numbers<[1], [0], [0], [1], [0, 0, 1, 1], [], []>} : vector<48x28xf32>, vector<28x120xf32>, vector<48x120xf32> -> vector<48x120xf32>
    %37 = arith.addf %27, %36 : vector<48x120xf32>
    %c3_37 = arith.constant 3 : index
    %c0_38 = arith.constant 0 : index
    %c0_39 = arith.constant 0 : index
    %38 = vector.load %arg3[%c3_37, %c0_38, %c0_39] : memref<5x28x120xf32, #tpu.memory_space<vmem>>, vector<1x28x120xf32>
    %39 = vector.shape_cast %38 : vector<1x28x120xf32> to vector<28x120xf32>
    %cst_40 = arith.constant dense<0.000000e+00> : vector<48x120xf32>
    %40 = tpu.matmul %33, %39, %cst_40 {dimension_numbers = #tpu.dot_dimension_numbers<[1], [0], [0], [1], [0, 0, 1, 1], [], []>} : vector<48x28xf32>, vector<28x120xf32>, vector<48x120xf32> -> vector<48x120xf32>
    %41 = arith.addf %31, %40 : vector<48x120xf32>
    %c0_41 = arith.constant 0 : index
    %c4 = arith.constant 4 : index
    %c0_42 = arith.constant 0 : index
    %42 = vector.load %arg1[%c0_41, %c4, %c0_42] : memref<2x28x28xf32, #tpu.memory_space<vmem>>, vector<2x24x28xf32>
    %43 = vector.shape_cast %42 : vector<2x24x28xf32> to vector<48x28xf32>
    %c4_43 = arith.constant 4 : index
    %c0_44 = arith.constant 0 : index
    %c0_45 = arith.constant 0 : index
    %44 = vector.load %arg2[%c4_43, %c0_44, %c0_45] : memref<5x28x120xf32, #tpu.memory_space<vmem>>, vector<1x28x120xf32>
    %45 = vector.shape_cast %44 : vector<1x28x120xf32> to vector<28x120xf32>
    %cst_46 = arith.constant dense<0.000000e+00> : vector<48x120xf32>
    %46 = tpu.matmul %43, %45, %cst_46 {dimension_numbers = #tpu.dot_dimension_numbers<[1], [0], [0], [1], [0, 0, 1, 1], [], []>} : vector<48x28xf32>, vector<28x120xf32>, vector<48x120xf32> -> vector<48x120xf32>
    %47 = arith.addf %37, %46 : vector<48x120xf32>
    %c4_47 = arith.constant 4 : index
    %c0_48 = arith.constant 0 : index
    %c0_49 = arith.constant 0 : index
    %48 = vector.load %arg3[%c4_47, %c0_48, %c0_49] : memref<5x28x120xf32, #tpu.memory_space<vmem>>, vector<1x28x120xf32>
    %49 = vector.shape_cast %48 : vector<1x28x120xf32> to vector<28x120xf32>
    %cst_50 = arith.constant dense<0.000000e+00> : vector<48x120xf32>
    %50 = tpu.matmul %43, %49, %cst_50 {dimension_numbers = #tpu.dot_dimension_numbers<[1], [0], [0], [1], [0, 0, 1, 1], [], []>} : vector<48x28xf32>, vector<28x120xf32>, vector<48x120xf32> -> vector<48x120xf32>
    %51 = arith.addf %41, %50 : vector<48x120xf32>
    %52 = arith.maximumf %47, %51 : vector<48x120xf32>
    %53 = vector.shape_cast %52 : vector<48x120xf32> to vector<2x24x120xf32>
    %c0_51 = arith.constant 0 : index
    %c0_52 = arith.constant 0 : index
    %c0_53 = arith.constant 0 : index
    %54 = vector.load %arg13[%c0_51, %c0_52, %c0_53] : memref<2x24x120xf32, #tpu.memory_space<vmem>>, vector<2x24x120xf32>
    tpu.vector_store %arg13[%c0_51, %c0_52, %c0_53], %53 {strides = array<i32>} : memref<2x24x120xf32, #tpu.memory_space<vmem>>, vector<2x24x120xf32>,
    %c0_54 = arith.constant 0 : index
    %c0_55 = arith.constant 0 : index
    %c0_56 = arith.constant 0 : index
    %55 = tpu.strided_load %arg13[%c0_54, %c0_55, %c0_56] {strides = array<i32: 1, 2, 1>} : memref<2x24x120xf32, #tpu.memory_space<vmem>>, vector<2x12x120xf32>
    %c0_57 = arith.constant 0 : index
    %c1_58 = arith.constant 1 : index
    %c0_59 = arith.constant 0 : index
    %56 = tpu.strided_load %arg13[%c0_57, %c1_58, %c0_59] {strides = array<i32: 1, 2, 1>} : memref<2x24x120xf32, #tpu.memory_space<vmem>>, vector<2x12x120xf32>
    %57 = arith.maximumf %55, %56 : vector<2x12x120xf32>
    %c0_60 = arith.constant 0 : index
    %c0_61 = arith.constant 0 : index
    %58 = vector.load %arg6[%c0_60, %c0_61] : memref<1x120xf32, #tpu.memory_space<vmem>>, vector<1x120xf32>
    %59 = vector.shape_cast %58 : vector<1x120xf32> to vector<1x1x120xf32>
    %60 = vector.broadcast %59 : vector<1x1x120xf32> to vector<2x12x120xf32>
    %61 = arith.addf %57, %60 : vector<2x12x120xf32>
    %cst_62 = arith.constant 0.000000e+00 : f32
    %62 = vector.broadcast %cst_62 : f32 to vector<2x12x120xf32>
    %63 = arith.maximumf %61, %62 : vector<2x12x120xf32>
    %c0_63 = arith.constant 0 : index
    %c0_64 = arith.constant 0 : index
    %c0_65 = arith.constant 0 : index
    %64 = vector.load %arg14[%c0_63, %c0_64, %c0_65] : memref<2x12x120xf32, #tpu.memory_space<vmem>>, vector<2x12x120xf32>
    tpu.vector_store %arg14[%c0_63, %c0_64, %c0_65], %63 {strides = array<i32>} : memref<2x12x120xf32, #tpu.memory_space<vmem>>, vector<2x12x120xf32>,
    %cst_66 = arith.constant 0.000000e+00 : f32
    %65 = vector.broadcast %cst_66 : f32 to vector<16x80xf32>
    %cst_67 = arith.constant 0.000000e+00 : f32
    %66 = vector.broadcast %cst_67 : f32 to vector<16x80xf32>
    %c0_68 = arith.constant 0 : index
    %c0_69 = arith.constant 0 : index
    %c0_70 = arith.constant 0 : index
    %67 = vector.load %arg14[%c0_68, %c0_69, %c0_70] : memref<2x12x120xf32, #tpu.memory_space<vmem>>, vector<2x8x120xf32>
    %68 = vector.shape_cast %67 : vector<2x8x120xf32> to vector<16x120xf32>
    %c0_71 = arith.constant 0 : index
    %c0_72 = arith.constant 0 : index
    %c0_73 = arith.constant 0 : index
    %69 = vector.load %arg4[%c0_71, %c0_72, %c0_73] : memref<5x120x80xf32, #tpu.memory_space<vmem>>, vector<1x120x80xf32>
    %70 = vector.shape_cast %69 : vector<1x120x80xf32> to vector<120x80xf32>
    %cst_74 = arith.constant dense<0.000000e+00> : vector<16x80xf32>
    %71 = tpu.matmul %68, %70, %cst_74 {dimension_numbers = #tpu.dot_dimension_numbers<[1], [0], [0], [1], [0, 0, 1, 1], [], []>} : vector<16x120xf32>, vector<120x80xf32>, vector<16x80xf32> -> vector<16x80xf32>
    %72 = arith.addf %65, %71 : vector<16x80xf32>
    %c0_75 = arith.constant 0 : index
    %c0_76 = arith.constant 0 : index
    %c0_77 = arith.constant 0 : index
    %73 = vector.load %arg5[%c0_75, %c0_76, %c0_77] : memref<5x120x80xf32, #tpu.memory_space<vmem>>, vector<1x120x80xf32>
    %74 = vector.shape_cast %73 : vector<1x120x80xf32> to vector<120x80xf32>
    %cst_78 = arith.constant dense<0.000000e+00> : vector<16x80xf32>
    %75 = tpu.matmul %68, %74, %cst_78 {dimension_numbers = #tpu.dot_dimension_numbers<[1], [0], [0], [1], [0, 0, 1, 1], [], []>} : vector<16x120xf32>, vector<120x80xf32>, vector<16x80xf32> -> vector<16x80xf32>
    %76 = arith.addf %66, %75 : vector<16x80xf32>
    %c0_79 = arith.constant 0 : index
    %c1_80 = arith.constant 1 : index
    %c0_81 = arith.constant 0 : index
    %77 = vector.load %arg14[%c0_79, %c1_80, %c0_81] : memref<2x12x120xf32, #tpu.memory_space<vmem>>, vector<2x8x120xf32>
    %78 = vector.shape_cast %77 : vector<2x8x120xf32> to vector<16x120xf32>
    %c1_82 = arith.constant 1 : index
    %c0_83 = arith.constant 0 : index
    %c0_84 = arith.constant 0 : index
    %79 = vector.load %arg4[%c1_82, %c0_83, %c0_84] : memref<5x120x80xf32, #tpu.memory_space<vmem>>, vector<1x120x80xf32>
    %80 = vector.shape_cast %79 : vector<1x120x80xf32> to vector<120x80xf32>
    %cst_85 = arith.constant dense<0.000000e+00> : vector<16x80xf32>
    %81 = tpu.matmul %78, %80, %cst_85 {dimension_numbers = #tpu.dot_dimension_numbers<[1], [0], [0], [1], [0, 0, 1, 1], [], []>} : vector<16x120xf32>, vector<120x80xf32>, vector<16x80xf32> -> vector<16x80xf32>
    %82 = arith.addf %72, %81 : vector<16x80xf32>
    %c1_86 = arith.constant 1 : index
    %c0_87 = arith.constant 0 : index
    %c0_88 = arith.constant 0 : index
    %83 = vector.load %arg5[%c1_86, %c0_87, %c0_88] : memref<5x120x80xf32, #tpu.memory_space<vmem>>, vector<1x120x80xf32>
    %84 = vector.shape_cast %83 : vector<1x120x80xf32> to vector<120x80xf32>
    %cst_89 = arith.constant dense<0.000000e+00> : vector<16x80xf32>
    %85 = tpu.matmul %78, %84, %cst_89 {dimension_numbers = #tpu.dot_dimension_numbers<[1], [0], [0], [1], [0, 0, 1, 1], [], []>} : vector<16x120xf32>, vector<120x80xf32>, vector<16x80xf32> -> vector<16x80xf32>
    %86 = arith.addf %76, %85 : vector<16x80xf32>
    %c0_90 = arith.constant 0 : index
    %c2_91 = arith.constant 2 : index
    %c0_92 = arith.constant 0 : index
    %87 = vector.load %arg14[%c0_90, %c2_91, %c0_92] : memref<2x12x120xf32, #tpu.memory_space<vmem>>, vector<2x8x120xf32>
    %88 = vector.shape_cast %87 : vector<2x8x120xf32> to vector<16x120xf32>
    %c2_93 = arith.constant 2 : index
    %c0_94 = arith.constant 0 : index
    %c0_95 = arith.constant 0 : index
    %89 = vector.load %arg4[%c2_93, %c0_94, %c0_95] : memref<5x120x80xf32, #tpu.memory_space<vmem>>, vector<1x120x80xf32>
    %90 = vector.shape_cast %89 : vector<1x120x80xf32> to vector<120x80xf32>
    %cst_96 = arith.constant dense<0.000000e+00> : vector<16x80xf32>
    %91 = tpu.matmul %88, %90, %cst_96 {dimension_numbers = #tpu.dot_dimension_numbers<[1], [0], [0], [1], [0, 0, 1, 1], [], []>} : vector<16x120xf32>, vector<120x80xf32>, vector<16x80xf32> -> vector<16x80xf32>
    %92 = arith.addf %82, %91 : vector<16x80xf32>
    %c2_97 = arith.constant 2 : index
    %c0_98 = arith.constant 0 : index
    %c0_99 = arith.constant 0 : index
    %93 = vector.load %arg5[%c2_97, %c0_98, %c0_99] : memref<5x120x80xf32, #tpu.memory_space<vmem>>, vector<1x120x80xf32>
    %94 = vector.shape_cast %93 : vector<1x120x80xf32> to vector<120x80xf32>
    %cst_100 = arith.constant dense<0.000000e+00> : vector<16x80xf32>
    %95 = tpu.matmul %88, %94, %cst_100 {dimension_numbers = #tpu.dot_dimension_numbers<[1], [0], [0], [1], [0, 0, 1, 1], [], []>} : vector<16x120xf32>, vector<120x80xf32>, vector<16x80xf32> -> vector<16x80xf32>
    %96 = arith.addf %86, %95 : vector<16x80xf32>
    %c0_101 = arith.constant 0 : index
    %c3_102 = arith.constant 3 : index
    %c0_103 = arith.constant 0 : index
    %97 = vector.load %arg14[%c0_101, %c3_102, %c0_103] : memref<2x12x120xf32, #tpu.memory_space<vmem>>, vector<2x8x120xf32>
    %98 = vector.shape_cast %97 : vector<2x8x120xf32> to vector<16x120xf32>
    %c3_104 = arith.constant 3 : index
    %c0_105 = arith.constant 0 : index
    %c0_106 = arith.constant 0 : index
    %99 = vector.load %arg4[%c3_104, %c0_105, %c0_106] : memref<5x120x80xf32, #tpu.memory_space<vmem>>, vector<1x120x80xf32>
    %100 = vector.shape_cast %99 : vector<1x120x80xf32> to vector<120x80xf32>
    %cst_107 = arith.constant dense<0.000000e+00> : vector<16x80xf32>
    %101 = tpu.matmul %98, %100, %cst_107 {dimension_numbers = #tpu.dot_dimension_numbers<[1], [0], [0], [1], [0, 0, 1, 1], [], []>} : vector<16x120xf32>, vector<120x80xf32>, vector<16x80xf32> -> vector<16x80xf32>
    %102 = arith.addf %92, %101 : vector<16x80xf32>
    %c3_108 = arith.constant 3 : index
    %c0_109 = arith.constant 0 : index
    %c0_110 = arith.constant 0 : index
    %103 = vector.load %arg5[%c3_108, %c0_109, %c0_110] : memref<5x120x80xf32, #tpu.memory_space<vmem>>, vector<1x120x80xf32>
    %104 = vector.shape_cast %103 : vector<1x120x80xf32> to vector<120x80xf32>
    %cst_111 = arith.constant dense<0.000000e+00> : vector<16x80xf32>
    %105 = tpu.matmul %98, %104, %cst_111 {dimension_numbers = #tpu.dot_dimension_numbers<[1], [0], [0], [1], [0, 0, 1, 1], [], []>} : vector<16x120xf32>, vector<120x80xf32>, vector<16x80xf32> -> vector<16x80xf32>
    %106 = arith.addf %96, %105 : vector<16x80xf32>
    %c0_112 = arith.constant 0 : index
    %c4_113 = arith.constant 4 : index
    %c0_114 = arith.constant 0 : index
    %107 = vector.load %arg14[%c0_112, %c4_113, %c0_114] : memref<2x12x120xf32, #tpu.memory_space<vmem>>, vector<2x8x120xf32>
    %108 = vector.shape_cast %107 : vector<2x8x120xf32> to vector<16x120xf32>
    %c4_115 = arith.constant 4 : index
    %c0_116 = arith.constant 0 : index
    %c0_117 = arith.constant 0 : index
    %109 = vector.load %arg4[%c4_115, %c0_116, %c0_117] : memref<5x120x80xf32, #tpu.memory_space<vmem>>, vector<1x120x80xf32>
    %110 = vector.shape_cast %109 : vector<1x120x80xf32> to vector<120x80xf32>
    %cst_118 = arith.constant dense<0.000000e+00> : vector<16x80xf32>
    %111 = tpu.matmul %108, %110, %cst_118 {dimension_numbers = #tpu.dot_dimension_numbers<[1], [0], [0], [1], [0, 0, 1, 1], [], []>} : vector<16x120xf32>, vector<120x80xf32>, vector<16x80xf32> -> vector<16x80xf32>
    %112 = arith.addf %102, %111 : vector<16x80xf32>
    %c4_119 = arith.constant 4 : index
    %c0_120 = arith.constant 0 : index
    %c0_121 = arith.constant 0 : index
    %113 = vector.load %arg5[%c4_119, %c0_120, %c0_121] : memref<5x120x80xf32, #tpu.memory_space<vmem>>, vector<1x120x80xf32>
    %114 = vector.shape_cast %113 : vector<1x120x80xf32> to vector<120x80xf32>
    %cst_122 = arith.constant dense<0.000000e+00> : vector<16x80xf32>
    %115 = tpu.matmul %108, %114, %cst_122 {dimension_numbers = #tpu.dot_dimension_numbers<[1], [0], [0], [1], [0, 0, 1, 1], [], []>} : vector<16x120xf32>, vector<120x80xf32>, vector<16x80xf32> -> vector<16x80xf32>
    %116 = arith.addf %106, %115 : vector<16x80xf32>
    %117 = arith.maximumf %112, %116 : vector<16x80xf32>
    %118 = vector.shape_cast %117 : vector<16x80xf32> to vector<2x8x80xf32>
    %c0_123 = arith.constant 0 : index
    %c0_124 = arith.constant 0 : index
    %c0_125 = arith.constant 0 : index
    %119 = vector.load %arg15[%c0_123, %c0_124, %c0_125] : memref<2x8x80xf32, #tpu.memory_space<vmem>>, vector<2x8x80xf32>
    tpu.vector_store %arg15[%c0_123, %c0_124, %c0_125], %118 {strides = array<i32>} : memref<2x8x80xf32, #tpu.memory_space<vmem>>, vector<2x8x80xf32>,
    %c0_126 = arith.constant 0 : index
    %c0_127 = arith.constant 0 : index
    %c0_128 = arith.constant 0 : index
    %120 = tpu.strided_load %arg15[%c0_126, %c0_127, %c0_128] {strides = array<i32: 1, 2, 1>} : memref<2x8x80xf32, #tpu.memory_space<vmem>>, vector<2x4x80xf32>
    %c0_129 = arith.constant 0 : index
    %c1_130 = arith.constant 1 : index
    %c0_131 = arith.constant 0 : index
    %121 = tpu.strided_load %arg15[%c0_129, %c1_130, %c0_131] {strides = array<i32: 1, 2, 1>} : memref<2x8x80xf32, #tpu.memory_space<vmem>>, vector<2x4x80xf32>
    %122 = arith.maximumf %120, %121 : vector<2x4x80xf32>
    %c0_132 = arith.constant 0 : index
    %c0_133 = arith.constant 0 : index
    %123 = vector.load %arg7[%c0_132, %c0_133] : memref<1x80xf32, #tpu.memory_space<vmem>>, vector<1x80xf32>
    %124 = vector.shape_cast %123 : vector<1x80xf32> to vector<1x1x80xf32>
    %125 = vector.broadcast %124 : vector<1x1x80xf32> to vector<2x4x80xf32>
    %126 = arith.addf %122, %125 : vector<2x4x80xf32>
    %cst_134 = arith.constant 0.000000e+00 : f32
    %127 = vector.broadcast %cst_134 : f32 to vector<2x4x80xf32>
    %128 = arith.maximumf %126, %127 : vector<2x4x80xf32>
    %c0_135 = arith.constant 0 : index
    %c0_136 = arith.constant 0 : index
    %129 = vector.load %arg9[%c0_135, %c0_136] : memref<1x50xf32, #tpu.memory_space<vmem>>, vector<1x50xf32>
    %130 = vector.extract_strided_slice %128 {offsets = [0, 0, 0], sizes = [2, 1, 80], strides = [1, 1, 1]} : vector<2x4x80xf32> to vector<2x1x80xf32>
    %131 = vector.shape_cast %130 : vector<2x1x80xf32> to vector<2x80xf32>
    %c0_137 = arith.constant 0 : index
    %c0_138 = arith.constant 0 : index
    %c0_139 = arith.constant 0 : index
    %132 = vector.load %arg8[%c0_137, %c0_138, %c0_139] : memref<4x80x50xf32, #tpu.memory_space<vmem>>, vector<1x80x50xf32>
    %133 = vector.shape_cast %132 : vector<1x80x50xf32> to vector<80x50xf32>
    %cst_140 = arith.constant dense<0.000000e+00> : vector<2x50xf32>
    %134 = tpu.matmul %131, %133, %cst_140 {dimension_numbers = #tpu.dot_dimension_numbers<[1], [0], [0], [1], [0, 0, 1, 1], [], []>} : vector<2x80xf32>, vector<80x50xf32>, vector<2x50xf32> -> vector<2x50xf32>
    %135 = vector.broadcast %129 : vector<1x50xf32> to vector<2x50xf32>
    %136 = arith.addf %135, %134 : vector<2x50xf32>
    %137 = vector.extract_strided_slice %128 {offsets = [0, 1, 0], sizes = [2, 1, 80], strides = [1, 1, 1]} : vector<2x4x80xf32> to vector<2x1x80xf32>
    %138 = vector.shape_cast %137 : vector<2x1x80xf32> to vector<2x80xf32>
    %c1_141 = arith.constant 1 : index
    %c0_142 = arith.constant 0 : index
    %c0_143 = arith.constant 0 : index
    %139 = vector.load %arg8[%c1_141, %c0_142, %c0_143] : memref<4x80x50xf32, #tpu.memory_space<vmem>>, vector<1x80x50xf32>
    %140 = vector.shape_cast %139 : vector<1x80x50xf32> to vector<80x50xf32>
    %cst_144 = arith.constant dense<0.000000e+00> : vector<2x50xf32>
    %141 = tpu.matmul %138, %140, %cst_144 {dimension_numbers = #tpu.dot_dimension_numbers<[1], [0], [0], [1], [0, 0, 1, 1], [], []>} : vector<2x80xf32>, vector<80x50xf32>, vector<2x50xf32> -> vector<2x50xf32>
    %142 = arith.addf %136, %141 : vector<2x50xf32>
    %143 = vector.extract_strided_slice %128 {offsets = [0, 2, 0], sizes = [2, 1, 80], strides = [1, 1, 1]} : vector<2x4x80xf32> to vector<2x1x80xf32>
    %144 = vector.shape_cast %143 : vector<2x1x80xf32> to vector<2x80xf32>
    %c2_145 = arith.constant 2 : index
    %c0_146 = arith.constant 0 : index
    %c0_147 = arith.constant 0 : index
    %145 = vector.load %arg8[%c2_145, %c0_146, %c0_147] : memref<4x80x50xf32, #tpu.memory_space<vmem>>, vector<1x80x50xf32>
    %146 = vector.shape_cast %145 : vector<1x80x50xf32> to vector<80x50xf32>
    %cst_148 = arith.constant dense<0.000000e+00> : vector<2x50xf32>
    %147 = tpu.matmul %144, %146, %cst_148 {dimension_numbers = #tpu.dot_dimension_numbers<[1], [0], [0], [1], [0, 0, 1, 1], [], []>} : vector<2x80xf32>, vector<80x50xf32>, vector<2x50xf32> -> vector<2x50xf32>
    %148 = arith.addf %142, %147 : vector<2x50xf32>
    %149 = vector.extract_strided_slice %128 {offsets = [0, 3, 0], sizes = [2, 1, 80], strides = [1, 1, 1]} : vector<2x4x80xf32> to vector<2x1x80xf32>
    %150 = vector.shape_cast %149 : vector<2x1x80xf32> to vector<2x80xf32>
    %c3_149 = arith.constant 3 : index
    %c0_150 = arith.constant 0 : index
    %c0_151 = arith.constant 0 : index
    %151 = vector.load %arg8[%c3_149, %c0_150, %c0_151] : memref<4x80x50xf32, #tpu.memory_space<vmem>>, vector<1x80x50xf32>
    %152 = vector.shape_cast %151 : vector<1x80x50xf32> to vector<80x50xf32>
    %cst_152 = arith.constant dense<0.000000e+00> : vector<2x50xf32>
    %153 = tpu.matmul %150, %152, %cst_152 {dimension_numbers = #tpu.dot_dimension_numbers<[1], [0], [0], [1], [0, 0, 1, 1], [], []>} : vector<2x80xf32>, vector<80x50xf32>, vector<2x50xf32> -> vector<2x50xf32>
    %154 = arith.addf %148, %153 : vector<2x50xf32>
    %cst_153 = arith.constant 0.000000e+00 : f32
    %155 = vector.broadcast %cst_153 : f32 to vector<2x50xf32>
    %156 = arith.maximumf %154, %155 : vector<2x50xf32>
    %c0_154 = arith.constant 0 : index
    %c0_155 = arith.constant 0 : index
    %157 = vector.load %arg10[%c0_154, %c0_155] : memref<50x10xf32, #tpu.memory_space<vmem>>, vector<50x10xf32>
    %cst_156 = arith.constant dense<0.000000e+00> : vector<2x10xf32>
    %158 = tpu.matmul %156, %157, %cst_156 {dimension_numbers = #tpu.dot_dimension_numbers<[1], [0], [0], [1], [0, 0, 1, 1], [], []>} : vector<2x50xf32>, vector<50x10xf32>, vector<2x10xf32> -> vector<2x10xf32>
    %c0_157 = arith.constant 0 : index
    %c0_158 = arith.constant 0 : index
    %159 = vector.load %arg11[%c0_157, %c0_158] : memref<1x10xf32, #tpu.memory_space<vmem>>, vector<1x10xf32>
    %160 = vector.broadcast %159 : vector<1x10xf32> to vector<2x10xf32>
    %161 = arith.addf %158, %160 : vector<2x10xf32>
    %cst_159 = arith.constant dense<0xFF800000> : vector<2xf32>
    %162 = vector.multi_reduction <maximumf>, %161, %cst_159 [1] : vector<2x10xf32> to vector<2xf32>
    %163 = vector.shape_cast %162 : vector<2xf32> to vector<2x1xf32>
    %164 = vector.broadcast %163 : vector<2x1xf32> to vector<2x10xf32>
    %165 = arith.subf %161, %164 : vector<2x10xf32>
    %166 = math.exp %165 : vector<2x10xf32>
    %cst_160 = arith.constant dense<0.000000e+00> : vector<2xf32>
    %167 = vector.multi_reduction <add>, %166, %cst_160 [1] : vector<2x10xf32> to vector<2xf32>
    %168 = vector.shape_cast %167 : vector<2xf32> to vector<2x1xf32>
    %169 = math.log %168 : vector<2x1xf32>
    %170 = vector.broadcast %169 : vector<2x1xf32> to vector<2x10xf32>
    %171 = arith.subf %165, %170 : vector<2x10xf32>
    %c0_161 = arith.constant 0 : index
    %c0_162 = arith.constant 0 : index
    %172 = vector.load %arg12[%c0_161, %c0_162] : memref<2x10xf32, #tpu.memory_space<vmem>>, vector<2x10xf32>
    tpu.vector_store %arg12[%c0_161, %c0_162], %171 {strides = array<i32>} : memref<2x10xf32, #tpu.memory_space<vmem>>, vector<2x10xf32>,
    return
  }
  func.func @transform_0(%arg0: i32) -> (i32, i32, i32) {
    %c0_i32 = arith.constant 0 : i32
    %c0_i32_0 = arith.constant 0 : i32
    %c0_i32_1 = arith.constant 0 : i32
    return %arg0, %c0_i32, %c0_i32_0 : i32, i32, i32
  }
  func.func @transform_1(%arg0: i32) -> (i32, i32, i32) {
    %c0_i32 = arith.constant 0 : i32
    %c0_i32_0 = arith.constant 0 : i32
    %c0_i32_1 = arith.constant 0 : i32
    %c0_i32_2 = arith.constant 0 : i32
    return %c0_i32, %c0_i32_0, %c0_i32_1 : i32, i32, i32
  }
  func.func @transform_2(%arg0: i32) -> (i32, i32, i32) {
    %c0_i32 = arith.constant 0 : i32
    %c0_i32_0 = arith.constant 0 : i32
    %c0_i32_1 = arith.constant 0 : i32
    %c0_i32_2 = arith.constant 0 : i32
    return %c0_i32, %c0_i32_0, %c0_i32_1 : i32, i32, i32
  }
  func.func @transform_3(%arg0: i32) -> (i32, i32, i32) {
    %c0_i32 = arith.constant 0 : i32
    %c0_i32_0 = arith.constant 0 : i32
    %c0_i32_1 = arith.constant 0 : i32
    %c0_i32_2 = arith.constant 0 : i32
    return %c0_i32, %c0_i32_0, %c0_i32_1 : i32, i32, i32
  }
  func.func @transform_4(%arg0: i32) -> (i32, i32, i32) {
    %c0_i32 = arith.constant 0 : i32
    %c0_i32_0 = arith.constant 0 : i32
    %c0_i32_1 = arith.constant 0 : i32
    %c0_i32_2 = arith.constant 0 : i32
    return %c0_i32, %c0_i32_0, %c0_i32_1 : i32, i32, i32
  }
  func.func @transform_5(%arg0: i32) -> (i32, i32) {
    %c0_i32 = arith.constant 0 : i32
    %c0_i32_0 = arith.constant 0 : i32
    %c0_i32_1 = arith.constant 0 : i32
    return %c0_i32, %c0_i32_0 : i32, i32
  }
  func.func @transform_6(%arg0: i32) -> (i32, i32) {
    %c0_i32 = arith.constant 0 : i32
    %c0_i32_0 = arith.constant 0 : i32
    %c0_i32_1 = arith.constant 0 : i32
    return %c0_i32, %c0_i32_0 : i32, i32
  }
  func.func @transform_7(%arg0: i32) -> (i32, i32, i32) {
    %c0_i32 = arith.constant 0 : i32
    %c0_i32_0 = arith.constant 0 : i32
    %c0_i32_1 = arith.constant 0 : i32
    %c0_i32_2 = arith.constant 0 : i32
    return %c0_i32, %c0_i32_0, %c0_i32_1 : i32, i32, i32
  }
  func.func @transform_8(%arg0: i32) -> (i32, i32) {
    %c0_i32 = arith.constant 0 : i32
    %c0_i32_0 = arith.constant 0 : i32
    %c0_i32_1 = arith.constant 0 : i32
    return %c0_i32, %c0_i32_0 : i32, i32
  }
  func.func @transform_9(%arg0: i32) -> (i32, i32) {
    %c0_i32 = arith.constant 0 : i32
    %c0_i32_0 = arith.constant 0 : i32
    %c0_i32_1 = arith.constant 0 : i32
    return %c0_i32, %c0_i32_0 : i32, i32
  }
  func.func @transform_10(%arg0: i32) -> (i32, i32) {
    %c0_i32 = arith.constant 0 : i32
    %c0_i32_0 = arith.constant 0 : i32
    %c0_i32_1 = arith.constant 0 : i32
    return %c0_i32, %c0_i32_0 : i32, i32
  }
  func.func @transform_11(%arg0: i32) -> (i32, i32) {
    %c0_i32 = arith.constant 0 : i32
    %c0_i32_0 = arith.constant 0 : i32
    return %arg0, %c0_i32 : i32, i32
  }
}

</mosaic_0001>

<bundles_post_ra>
// kernel: tile.13
= control target key start
LH: loop header
LB: loop body
LE: loop exit
PB: predicated region body
PF: predicated region fallthrough
CT: control target
= control target key end

     0   :  { %s28_s0 = inlined_call_operand.vmem [shape: f32[10], index: 0, kind: input, shape index: {}]   ;;  %s29_s1 = inlined_call_operand.vmem [shape: f32[12,10], index: 1, kind: output, shape index: {}]  }
   0x1   :  { %v4_v0 = vld [vmem:[%s28_s0] ss:$0 sm:$0xff] }
   0x2   :  { %5 = vst [vmem:[%s29_s1] sm:$0xff] %v4_v0  ;;  %8 = vst [vmem:[%s29_s1 + $0x8] sm:$0xff] %v4_v0 }

// kernel: tile.14
= control target key start
LH: loop header
LB: loop body
LE: loop exit
PB: predicated region body
PF: predicated region fallthrough
CT: control target
= control target key end

     0   :  { %s99_s10 = smov 110   ;;  %s100_s11 = smov 90   ;;  %vm3_vm0 = vcmask 80896   ;;  %vm9_vm1 = vcmask 982896   ;;  %vm15_vm2 = vcmask 900896   ;;  %vm21_vm3 = vcmask 818896   ;;  %s159_s0 = inlined_call_operand.vmem [shape: f32[12,10], index: 0, kind: input, shape index: {}]   ;;  %s160_s1 = inlined_call_operand.vmem [shape: f32[1,120], index: 1, kind: output, shape index: {}]  }
   0x1   :  { %v77_v0 = vld [vmem:[%s159_s0 + $0xb] sm:$0x1]   ;;  %v79_v1 = vld [vmem:[%s159_s0 + $0x9] sm:$0x1]   ;;  %v78_v2 = vld [vmem:[%s159_s0 + $0xa] sm:$0x1]  }
   0x2   :  { %7 = vrot.lane.b32.xlu0 %v77_v0, %s99_s10  ;;  %19 = vrot.lane.b32.xlu1 %v79_v1, %s100_s11  ;;  %v80_v3 = vld [vmem:[%s159_s0 + $0x8] sm:$0x1]   ;;  %s101_s16 = smov 100   ;;  %s102_s17 = smov 80   ;;  %v81_v4 = vld [vmem:[%s159_s0 + $0x7] sm:$0x1]  }
   0x3   :  { %v2_v5 = vld [vmem:[%s159_s0] sm:$0x1]   ;;  %v82_v6 = vld [vmem:[%s159_s0 + $0x6] sm:$0x1]   ;;  %s103_s24 = smov 70   ;;  %s104_s25 = smov 60  }
   0x4   :  { %4 = vst.msk [vmem:[#allocation0] sm:$0x1] %vm3_vm0, %v2_v5   ;;  %v83_v7 = vld [vmem:[%s159_s0 + $0x5] sm:$0x1]   ;;  %v84_v8 = vld [vmem:[%s159_s0 + $0x4] sm:$0x1]  }
   0x5   :  { %s105_s30 = smov 50   ;;  %s106_s2 = smov 40   ;;  %v85_v9 = vld [vmem:[%s159_s0 + $0x3] sm:$0x1]   ;;  %v86_v10 = vld [vmem:[%s159_s0 + $0x2] sm:$0x1]  }
   0x6   :  { %13 = vrot.lane.b32.xlu0 %v78_v2, %s101_s16  ;;  %25 = vrot.lane.b32.xlu1 %v80_v3, %s102_s17  ;;  %s107_s7 = smov 30   ;;  %s108_s8 = smov 20   ;;  %v87_v11 = vld [vmem:[%s159_s0 + $0x1] sm:$0x1]   ;;  %vm27_vm4 = vcmask 736896   ;;  %vm33_vm5 = vcmask 654896  }
   0x7   :  { %s109_s0 = smov 10   ;;  %vm39_vm6 = vcmask 572896   ;;  %vm45_vm7 = vcmask 490896   ;;  %vm51_vm8 = vcmask 408896   ;;  %vm57_vm9 = vcmask 326896  }
   0x8   :  { %vm63_vm10 = vcmask 244896   ;;  %vm69_vm11 = vcmask 162896  }
   0xa   :  { %31 = vrot.lane.b32.xlu0 %v81_v4, %s103_s24  ;;  %37 = vrot.lane.b32.xlu1 %v82_v6, %s104_s25 }
   0xe   :  { %43 = vrot.lane.b32.xlu0 %v83_v7, %s105_s30  ;;  %49 = vrot.lane.b32.xlu1 %v84_v8, %s106_s2 }
  0x12   :  { %55 = vrot.lane.b32.xlu0 %v85_v9, %s107_s7  ;;  %61 = vrot.lane.b32.xlu1 %v86_v10, %s108_s8 }
  0x16   :  { %67 = vrot.lane.b32.xlu0 %v87_v11, %s109_s0 }
  0x74   :  { %v8_v12 = vpop.permute.xlu0 %7   ;;  %v20_v13 = vpop.permute.xlu1 %19  }
  0x75   :  { %10 = vst.msk [vmem:[#allocation0] sm:$0x1] %vm9_vm1, %v8_v12  }
  0x78   :  { %v14_v14 = vpop.permute.xlu0 %13   ;;  %v26_v15 = vpop.permute.xlu1 %25  }
  0x79   :  { %16 = vst.msk [vmem:[#allocation0] sm:$0x1] %vm15_vm2, %v14_v14  }
  0x7a   :  { %22 = vst.msk [vmem:[#allocation0] sm:$0x1] %vm21_vm3, %v20_v13  }
  0x7b   :  { %28 = vst.msk [vmem:[#allocation0] sm:$0x1] %vm27_vm4, %v26_v15  }
  0x7c   :  { %v32_v16 = vpop.permute.xlu0 %31   ;;  %v38_v17 = vpop.permute.xlu1 %37  }
  0x7d   :  { %34 = vst.msk [vmem:[#allocation0] sm:$0x1] %vm33_vm5, %v32_v16  }
  0x7e   :  { %40 = vst.msk [vmem:[#allocation0] sm:$0x1] %vm39_vm6, %v38_v17  }
  0x80   :  { %v44_v18 = vpop.permute.xlu0 %43   ;;  %v50_v19 = vpop.permute.xlu1 %49  }
  0x81   :  { %46 = vst.msk [vmem:[#allocation0] sm:$0x1] %vm45_vm7, %v44_v18  }
  0x82   :  { %52 = vst.msk [vmem:[#allocation0] sm:$0x1] %vm51_vm8, %v50_v19  }
  0x84   :  { %v56_v20 = vpop.permute.xlu0 %55   ;;  %v62_v21 = vpop.permute.xlu1 %61  }
  0x85   :  { %58 = vst.msk [vmem:[#allocation0] sm:$0x1] %vm57_vm9, %v56_v20  }
  0x86   :  { %64 = vst.msk [vmem:[#allocation0] sm:$0x1] %vm63_vm10, %v62_v21  }
  0x88   :  { %v68_v22 = vpop.permute.xlu0 %67  }
  0x89   :  { %70 = vst.msk [vmem:[#allocation0] sm:$0x1] %vm69_vm11, %v68_v22  }
  0x90   :  { %v74_v23 = vld [vmem:[#allocation0] sm:$0x1] }
  0x91   :  { %76 = vst [vmem:[%s160_s1] sm:$0x1] %v74_v23 }

// kernel: tile.18
= control target key start
LH: loop header
LB: loop body
LE: loop exit
PB: predicated region body
PF: predicated region fallthrough
CT: control target
= control target key end

     0   :  { %s22_s0 = inlined_call_operand.vmem [shape: f32[20], index: 0, kind: input, shape index: {}]   ;;  %s23_s1 = inlined_call_operand.vmem [shape: f32[4,20], index: 1, kind: output, shape index: {}]  }
   0x1   :  { %v4_v0 = vld [vmem:[%s22_s0] ss:$0 sm:$0xff] }
   0x2   :  { %5 = vst [vmem:[%s23_s1] sm:$0xf] %v4_v0 }

// kernel: tile.19
= control target key start
LH: loop header
LB: loop body
LE: loop exit
PB: predicated region body
PF: predicated region fallthrough
CT: control target
= control target key end

     0   :  { %vm7_vm0 = vcmask 162816   ;;  %s37_s8 = smov 20   ;;  %s38_s9 = smov 40   ;;  %vm13_vm1 = vcmask 654816   ;;  %vm19_vm2 = vcmask 490816   ;;  %vm25_vm3 = vcmask 326816   ;;  %s55_s0 = inlined_call_operand.vmem [shape: f32[4,20], index: 0, kind: input, shape index: {}]   ;;  %s56_s1 = inlined_call_operand.vmem [shape: f32[1,80], index: 1, kind: output, shape index: {}]  }
   0x1   :  { %v4_v0 = vld [vmem:[%s55_s0] sm:$0xf]  ;;  %s36_s0 = smov 60  }
   0x2   :  { %5 = vst [vmem:[#allocation1] sm:$0xf] %v4_v0 }
   0x9   :  { %v10_v1 = vld [vmem:[#allocation1 + $0x3] sm:$0x1]   ;;  %v22_v2 = vld [vmem:[#allocation1 + $0x1] sm:$0x1]   ;;  %v6_v3 = vld [vmem:[#allocation1] sm:$0x1]  }
   0xa   :  { %11 = vrot.lane.b32.xlu0 %v10_v1, %s36_s0  ;;  %23 = vrot.lane.b32.xlu1 %v22_v2, %s37_s8  ;;  %v16_v4 = vld [vmem:[#allocation1 + $0x2] sm:$0x1]   ;;  %8 = vst.msk [vmem:[#allocation0] sm:$0x1] %vm7_vm0, %v6_v3  }
   0xe   :  { %17 = vrot.lane.b32.xlu0 %v16_v4, %s38_s9 }
  0x7c   :  { %v12_v5 = vpop.permute.xlu0 %11   ;;  %v24_v6 = vpop.permute.xlu1 %23  }
  0x7d   :  { %14 = vst.msk [vmem:[#allocation0] sm:$0x1] %vm13_vm1, %v12_v5  }
  0x80   :  { %v18_v7 = vpop.permute.xlu0 %17  }
  0x81   :  { %20 = vst.msk [vmem:[#allocation0] sm:$0x1] %vm19_vm2, %v18_v7  }
  0x82   :  { %26 = vst.msk [vmem:[#allocation0] sm:$0x1] %vm25_vm3, %v24_v6  }
  0x89   :  { %v30_v8 = vld [vmem:[#allocation0] sm:$0x1] }
  0x8a   :  { %32 = vst [vmem:[%s56_s1] sm:$0x1] %v30_v8 }

// kernel: forward.1
= control target key start
LH: loop header
LB: loop body
LE: loop exit
PB: predicated region body
PF: predicated region fallthrough
CT: control target
= control target key end

     0   :  { %vm83_vm0 = vcmask 1043456   ;;  %vm4504_vm1 = vmmov 1   ;;  %vm64_vm3 = vcmask 228352   ;;  %s5629_s0 = inlined_call_operand.vmem [shape: f32[2,28,28], index: 0, kind: input, shape index: {}]   ;;  %s5630_s1 = inlined_call_operand.vmem [shape: f32[5,28,120], index: 1, kind: input, shape index: {}]   ;;  %s5631_s2 = inlined_call_operand.vmem [shape: f32[5,28,120], index: 2, kind: input, shape index: {}]   ;;  %s5632_s3 = inlined_call_operand.vmem [shape: f32[5,120,80], index: 3, kind: input, shape index: {}]   ;;  %s5633_s4 = inlined_call_operand.vmem [shape: f32[5,120,80], index: 4, kind: input, shape index: {}]   ;;  %s5634_s5 = inlined_call_operand.vmem [shape: f32[1,120], index: 5, kind: input, shape index: {}]   ;;  %s5635_s6 = inlined_call_operand.vmem [shape: f32[1,80], index: 6, kind: input, shape index: {}]   ;;  %s5636_s7 = inlined_call_operand.vmem [shape: f32[4,80,50], index: 7, kind: input, shape index: {}]   ;;  %s5637_s8 = inlined_call_operand.vmem [shape: f32[1,50], index: 8, kind: input, shape index: {}]   ;;  %s5638_s9 = inlined_call_operand.vmem [shape: f32[50,10], index: 9, kind: input, shape index: {}]   ;;  %s5639_s10 = inlined_call_operand.vmem [shape: f32[1,10], index: 10, kind: input, shape index: {}]   ;;  %s5640_s11 = inlined_call_operand.hbm [shape: f32[2,10], index: 11, kind: output, shape index: {}]  }
   0x1   :  { %v2738_v0 = vld [vmem:[%s5630_s1 + $0x20] sm:$0xff]  ;;  %v2739_v1 = vld [vmem:[%s5630_s1 + $0x28] sm:$0xff]  ;;  %v2740_v5 = vld [vmem:[%s5630_s1 + $0x30] sm:$0xff] }
   0x2   :  { %v2756_v2 = vld [vmem:[%s5631_s2 + $0x20] sm:$0xff]  ;;  %v3951_v3 = vpack.c.bf16 %v2739_v1, %v2738_v0  ;;  %v2757_v4 = vld [vmem:[%s5631_s2 + $0x28] sm:$0xff]  ;;  %v2741_v6 = vld [vmem:[%s5630_s1 + $0x38] sm:$0xf] }
   0x3   :  { %v3971_v7 = vpack.c.bf16 %v2757_v4, %v2756_v2  ;;  %v3955_v8 = vpack.c.bf16 %v2741_v6, %v2740_v5  ;;  %vm4587_vm2 = vmpackc.low %vm83_vm0, %vm4504_vm1  ;;  %v2758_v10 = vld [vmem:[%s5631_s2 + $0x30] sm:$0xff]  ;;  %v2759_v11 = vld [vmem:[%s5631_s2 + $0x38] sm:$0xf] }
   0x4   :  { %3952 = vmatprep.subr.bf16.mxu0 %v3951_v3  ;;  %v3975_v12 = vpack.c.bf16 %v2759_v11, %v2758_v10  ;;  %v53_v13 = vld [vmem:[%s5629_s0 + $0x1] sm:$0xff]  ;;  %v47_v20 = vld [vmem:[%s5630_s1 + $0x10] sm:$0xff]  ;;  %v48_v21 = vld [vmem:[%s5630_s1 + $0x18] sm:$0xf] }
   0x5   :  { %v45_v14 = vld [vmem:[%s5630_s1] sm:$0xff]  ;;  %3972 = vmatprep.subr.bf16.mxu1 %v3971_v7  ;;  %3954 = vmatpush3.bf16.msra.mxu0 %v3951_v3  ;;  %v46_v15 = vld [vmem:[%s5630_s1 + $0x8] sm:$0xff]  ;;  %v51_v23 = vld [vmem:[%s5631_s2 + $0x10] sm:$0xff]  ;;  %v3965_v26 = vpack.c.bf16 %v48_v21, %v47_v20 }
   0x6   :  { %v49_v16 = vld [vmem:[%s5631_s2] sm:$0xff]  ;;  %v50_v17 = vld [vmem:[%s5631_s2 + $0x8] sm:$0xff]  ;;  %3974 = vmatpush3.bf16.msra.mxu1 %v3971_v7  ;;  %3957 = vmatprep.subr.msk.bf16.mxu0 %vm4587_vm2, %v3955_v8  ;;  %v3961_v18 = vpack.c.bf16 %v46_v15, %v45_v14  ;;  %v52_v24 = vld [vmem:[%s5631_s2 + $0x18] sm:$0xf] }
   0x7   :  { %3977 = vmatprep.subr.msk.bf16.mxu1 %vm4587_vm2, %v3975_v12  ;;  %3350 = vmatprep.mubr.msk.f32.mxu0 %vm64_vm3, %v53_v13  ;;  %v3981_v19 = vpack.c.bf16 %v50_v17, %v49_v16  ;;  %v54_v22 = vld [vmem:[%s5629_s0 + $0x9] sm:$0xff]  ;;  %v55_v25 = vld [vmem:[%s5629_s0 + $0x11] sm:$0xff]  ;;  %v3985_v27 = vpack.c.bf16 %v52_v24, %v51_v23  ;;  %v2774_v28 = vld [vmem:[%s5630_s1 + $0x40] sm:$0xff] }
   0x8   :  { %3384 = vmatprep.mubr.msk.f32.mxu1 %vm64_vm3, %v53_v13  ;;  %v2775_v29 = vld [vmem:[%s5630_s1 + $0x48] sm:$0xff]  ;;  %v2785_v31 = vld [vmem:[%s5631_s2 + $0x40] sm:$0xff]  ;;  %v58_v36 = vld [vmem:[%s5629_s0 + $0x31] sm:$0xff] }
   0x9   :  { %3960 = vmatpush3.bf16.msk.msra.mxu0 %vm4587_vm2, %v3955_v8  ;;  %v56_v30 = vld [vmem:[%s5629_s0 + $0x21] sm:$0xff]  ;;  %v57_v33 = vld [vmem:[%s5629_s0 + $0x29] sm:$0xff]  ;;  %v3991_v34 = vpack.c.bf16 %v2775_v29, %v2774_v28  ;;  %v2777_v39 = vld [vmem:[%s5630_s1 + $0x58] sm:$0xf] }
   0xa   :  { %3980 = vmatpush3.bf16.msk.msra.mxu1 %vm4587_vm2, %v3975_v12  ;;  %3962 = vmatprep.subr.bf16.mxu0 %v3961_v18  ;;  %v2786_v32 = vld [vmem:[%s5631_s2 + $0x48] sm:$0xff]  ;;  %v39_v37 = vld [vmem:[%s5629_s0] sm:$0xff]  ;;  %v2776_v38 = vld [vmem:[%s5630_s1 + $0x50] sm:$0xff] }
   0xb   :  { %3982 = vmatprep.subr.bf16.mxu1 %v3981_v19  ;;  %v4001_v35 = vpack.c.bf16 %v2786_v32, %v2785_v31  ;;  %v40_v40 = vld [vmem:[%s5629_s0 + $0x8] sm:$0xff]  ;;  %v2787_v41 = vld [vmem:[%s5631_s2 + $0x50] sm:$0xff]  ;;  %v2788_v42 = vld [vmem:[%s5631_s2 + $0x58] sm:$0xf]  ;;  %v3995_v44 = vpack.c.bf16 %v2777_v39, %v2776_v38 }
   0xc   :  { %3351 = vmatmul.mubr.msk.f32.vlgmr.msra.gmra.mrb[0].mxu0 %vm64_vm3, %v54_v22  ;;  %v41_v43 = vld [vmem:[%s5629_s0 + $0x10] sm:$0xff]  ;;  %v4005_v45 = vpack.c.bf16 %v2788_v42, %v2787_v41  ;;  %v2796_v46 = vld [vmem:[%s5630_s1 + $0x60] sm:$0xff]  ;;  %v2797_v47 = vld [vmem:[%s5630_s1 + $0x68] sm:$0xff] }
   0xd   :  { %3385 = vmatmul.mubr.msk.f32.vlgmr.msra.gmra.mrb[0].mxu1 %vm64_vm3, %v54_v22  ;;  %3964 = vmatpush3.bf16.msra.mxu0 %v3961_v18 }
   0xe   :  { %3984 = vmatpush3.bf16.msra.mxu1 %v3981_v19  ;;  %3353 = vmatprep.mubr.msk.f32.mxu0 %vm64_vm3, %v55_v25 }
   0xf   :  { %3387 = vmatprep.mubr.msk.f32.mxu1 %vm64_vm3, %v55_v25  ;;  %3967 = vmatprep.subr.msk.bf16.mxu0 %vm4587_vm2, %v3965_v26 }
  0x10   :  { %3354 = vmatmul.mubr.msk.f32.gmra.mrb[2].mxu0 %vm64_vm3, %v56_v30  ;;  %3987 = vmatprep.subr.msk.bf16.mxu1 %vm4587_vm2, %v3985_v27 }
  0x11   :  { %3388 = vmatmul.mubr.msk.f32.gmra.mrb[2].mxu1 %vm64_vm3, %v56_v30  ;;  %3356 = vmatprep.mubr.msk.f32.mxu0 %vm64_vm3, %v57_v33 }
  0x12   :  { %3970 = vmatpush3.bf16.msk.msra.mxu0 %vm4587_vm2, %v3965_v26  ;;  %3390 = vmatprep.mubr.msk.f32.mxu1 %vm64_vm3, %v57_v33 }
  0x13   :  { %3990 = vmatpush3.bf16.msk.msra.mxu1 %vm4587_vm2, %v3985_v27  ;;  %3992 = vmatprep.subr.bf16.mxu0 %v3991_v34 }
  0x14   :  { %3357 = vmatmul.mubr.msk.f32.gmra.mrb[4].mxu0 %vm64_vm3, %v58_v36  ;;  %4002 = vmatprep.subr.bf16.mxu1 %v4001_v35 }
  0x15   :  { %3391 = vmatmul.mubr.msk.f32.gmra.mrb[4].mxu1 %vm64_vm3, %v58_v36  ;;  %3367 = vmatprep.mubr.msk.f32.mxu0 %vm64_vm3, %v39_v37 }
  0x16   :  { %3401 = vmatprep.mubr.msk.f32.mxu1 %vm64_vm3, %v39_v37 }
  0x18   :  { %3368 = vmatmul.mubr.msk.f32.vlgmr.msra.gmra.mrb[0].mxu0 %vm64_vm3, %v40_v40 }
  0x19   :  { %16 = vsyncpa [#allocation6], 0  ;;  %3402 = vmatmul.mubr.msk.f32.vlgmr.msra.gmra.mrb[0].mxu1 %vm64_vm3, %v40_v40  ;;  %3994 = vmatpush3.bf16.msra.mxu0 %v3991_v34  ;;  %v42_v48 = vld [vmem:[%s5629_s0 + $0x20] sm:$0xff]  ;;  %v2808_v50 = vld [vmem:[%s5631_s2 + $0x68] sm:$0xff]  ;;  %v4011_v52 = vpack.c.bf16 %v2797_v47, %v2796_v46  ;;  %vm1231_vm4 = vcmask 982016   ;;  %vm1273_vm5 = vcmask 977920  }
  0x1a   :  { %v2807_v49 = vld [vmem:[%s5631_s2 + $0x60] sm:$0xff]  ;;  %4004 = vmatpush3.bf16.msra.mxu1 %v4001_v35  ;;  %3370 = vmatprep.mubr.msk.f32.mxu0 %vm64_vm3, %v41_v43  ;;  %v43_v51 = vld [vmem:[%s5629_s0 + $0x28] sm:$0xff]  ;;  %v44_v54 = vld [vmem:[%s5629_s0 + $0x30] sm:$0xff]  ;;  %vm4506_vm6 = vmmov 0   ;;  %vm2239_vm7 = vcmask 654336   ;;  %vm2276_vm8 = vcmask 1041409  }
  0x1b   :  { %3404 = vmatprep.mubr.msk.f32.mxu1 %vm64_vm3, %v41_v43  ;;  %3997 = vmatprep.subr.msk.bf16.mxu0 %vm4587_vm2, %v3995_v44  ;;  %v4021_v53 = vpack.c.bf16 %v2808_v50, %v2807_v49  ;;  %v499_v55 = vld [vmem:[%s5629_s0 + $0x2] sm:$0xff]  ;;  %v2798_v56 = vld [vmem:[%s5630_s1 + $0x70] sm:$0xff]  ;;  %v2799_v57 = vld [vmem:[%s5630_s1 + $0x78] sm:$0xf]  ;;  %vm2636_vm9 = vcmask 1041408   ;;  %vm2632_vm10 = vcmask 408576  }
  0x1c   :  { %3371 = vmatmul.mubr.msk.f32.gmra.mrb[2].mxu0 %vm64_vm3, %v42_v48  ;;  %4007 = vmatprep.subr.msk.bf16.mxu1 %vm4587_vm2, %v4005_v45  ;;  %v500_v58 = vld [vmem:[%s5629_s0 + $0xa] sm:$0xff]  ;;  %v2810_v60 = vld [vmem:[%s5631_s2 + $0x78] sm:$0xf]  ;;  %v4015_v62 = vpack.c.bf16 %v2799_v57, %v2798_v56  ;;  %v2818_v0 = vld [vmem:[%s5630_s1 + $0x80] sm:$0xff]  ;;  %vm2710_vm11 = vcmask 74752  }
  0x1d   :  { %3405 = vmatmul.mubr.msk.f32.gmra.mrb[2].mxu1 %vm64_vm3, %v42_v48  ;;  %3373 = vmatprep.mubr.msk.f32.mxu0 %vm64_vm3, %v43_v51  ;;  %v2809_v59 = vld [vmem:[%s5631_s2 + $0x70] sm:$0xff]  ;;  %v2819_v1 = vld [vmem:[%s5630_s1 + $0x88] sm:$0xff]  ;;  %v2829_v3 = vld [vmem:[%s5631_s2 + $0x80] sm:$0xff] }
  0x1e   :  { %3407 = vmatprep.mubr.msk.f32.mxu1 %vm64_vm3, %v43_v51  ;;  %4000 = vmatpush3.bf16.msk.msra.mxu0 %vm4587_vm2, %v3995_v44  ;;  %v501_v61 = vld [vmem:[%s5629_s0 + $0x12] sm:$0xff]  ;;  %v4025_v63 = vpack.c.bf16 %v2810_v60, %v2809_v59  ;;  %v502_v2 = vld [vmem:[%s5629_s0 + $0x22] sm:$0xff]  ;;  %v503_v5 = vld [vmem:[%s5629_s0 + $0x2a] sm:$0xff]  ;;  %v4031_v6 = vpack.c.bf16 %v2819_v1, %v2818_v0 }
  0x1f   :  { %4010 = vmatpush3.bf16.msk.msra.mxu1 %vm4587_vm2, %v4005_v45  ;;  %4012 = vmatprep.subr.bf16.mxu0 %v4011_v52  ;;  %v2830_v4 = vld [vmem:[%s5631_s2 + $0x88] sm:$0xff]  ;;  %v504_v8 = vld [vmem:[%s5629_s0 + $0x32] sm:$0xff]  ;;  %v2842_v28 = vld [vmem:[%s5632_s3 + $0x80] sm:$0xff] }
  0x20   :  { %3374 = vmatmul.mubr.msk.f32.gmra.mrb[4].mxu0 %vm64_vm3, %v44_v54  ;;  %4022 = vmatprep.subr.bf16.mxu1 %v4021_v53  ;;  %v4041_v7 = vpack.c.bf16 %v2830_v4, %v2829_v3  ;;  %v741_v10 = vld [vmem:[%s5629_s0 + $0x3] sm:$0xff]  ;;  %v2820_v11 = vld [vmem:[%s5630_s1 + $0x90] sm:$0xff]  ;;  %v2821_v12 = vld [vmem:[%s5630_s1 + $0x98] sm:$0xf] }
  0x21   :  { %3408 = vmatmul.mubr.msk.f32.gmra.mrb[4].mxu1 %vm64_vm3, %v44_v54  ;;  %3418 = vmatprep.mubr.msk.f32.mxu0 %vm64_vm3, %v499_v55  ;;  %v742_v13 = vld [vmem:[%s5629_s0 + $0xb] sm:$0xff]  ;;  %v2832_v15 = vld [vmem:[%s5631_s2 + $0x98] sm:$0xf]  ;;  %v4035_v17 = vpack.c.bf16 %v2821_v12, %v2820_v11  ;;  %v744_v19 = vld [vmem:[%s5629_s0 + $0x23] sm:$0xff] }
  0x22   :  { %3435 = vmatprep.mubr.msk.f32.mxu1 %vm64_vm3, %v499_v55  ;;  %v2831_v14 = vld [vmem:[%s5631_s2 + $0x90] sm:$0xff]  ;;  %v983_v22 = vld [vmem:[%s5629_s0 + $0x4] sm:$0xff]  ;;  %v2841_v27 = vld [vmem:[%s5632_s3 + $0x78] sm:$0xff] }
  0x23   :  { %v743_v16 = vld [vmem:[%s5629_s0 + $0x13] sm:$0xff]  ;;  %v4045_v18 = vpack.c.bf16 %v2832_v15, %v2831_v14  ;;  %v745_v20 = vld [vmem:[%s5629_s0 + $0x2b] sm:$0xff]  ;;  %v1279_v29 = vld [vmem:[%s5632_s3] sm:$0xff]  ;;  %v4051_v30 = vpack.c.bf16 %v2842_v28, %v2841_v27 }
  0x24   :  { %3419 = vmatmul.mubr.msk.f32.vlgmr.msra.gmra.mrb[0].mxu0 %vm64_vm3, %v500_v58  ;;  %v746_v21 = vld [vmem:[%s5629_s0 + $0x33] sm:$0xff]  ;;  %v986_v9 = vld [vmem:[%s5629_s0 + $0x24] sm:$0xff] }
  0x25   :  { %3436 = vmatmul.mubr.msk.f32.vlgmr.msra.gmra.mrb[0].mxu1 %vm64_vm3, %v500_v58  ;;  %4014 = vmatpush3.bf16.msra.mxu0 %v4011_v52  ;;  %v984_v23 = vld [vmem:[%s5629_s0 + $0xc] sm:$0xff]  ;;  %v985_v24 = vld [vmem:[%s5629_s0 + $0x14] sm:$0xff]  ;;  %v2846_v40 = vld [vmem:[%s5632_s3 + $0xa0] sm:$0xff] }
  0x26   :  { %4024 = vmatpush3.bf16.msra.mxu1 %v4021_v53  ;;  %3421 = vmatprep.mubr.msk.f32.mxu0 %vm64_vm3, %v501_v61  ;;  %v987_v25 = vld [vmem:[%s5629_s0 + $0x2c] sm:$0xff]  ;;  %v988_v26 = vld [vmem:[%s5629_s0 + $0x34] sm:$0xff]  ;;  %v1283_v41 = vld [vmem:[%s5632_s3 + $0x20] sm:$0xff] }
  0x27   :  { %3438 = vmatprep.mubr.msk.f32.mxu1 %vm64_vm3, %v501_v61  ;;  %4017 = vmatprep.subr.msk.bf16.mxu0 %vm4587_vm2, %v4015_v62  ;;  %v1280_v31 = vld [vmem:[%s5632_s3 + $0x8] sm:$0xff]  ;;  %v2844_v34 = vld [vmem:[%s5632_s3 + $0x90] sm:$0xff]  ;;  %v1282_v37 = vld [vmem:[%s5632_s3 + $0x18] sm:$0xff] }
  0x28   :  { %3422 = vmatmul.mubr.msk.f32.gmra.mrb[2].mxu0 %vm64_vm3, %v502_v2  ;;  %4027 = vmatprep.subr.msk.bf16.mxu1 %vm4587_vm2, %v4025_v63  ;;  %v4079_v32 = vpack.c.bf16 %v1280_v31, %v1279_v29  ;;  %v2843_v33 = vld [vmem:[%s5632_s3 + $0x88] sm:$0xff]  ;;  %v1281_v35 = vld [vmem:[%s5632_s3 + $0x10] sm:$0xff]  ;;  %v2845_v39 = vld [vmem:[%s5632_s3 + $0x98] sm:$0xff] }
  0x29   :  { %3439 = vmatmul.mubr.msk.f32.gmra.mrb[2].mxu1 %vm64_vm3, %v502_v2  ;;  %3424 = vmatprep.mubr.msk.f32.mxu0 %vm64_vm3, %v503_v5  ;;  %v4055_v36 = vpack.c.bf16 %v2844_v34, %v2843_v33  ;;  %v4083_v38 = vpack.c.bf16 %v1282_v37, %v1281_v35  ;;  %v4059_v42 = vpack.c.bf16 %v2846_v40, %v2845_v39  ;;  %v1284_v43 = vld [vmem:[%s5632_s3 + $0x28] sm:$0xff]  ;;  %v2848_v46 = vld [vmem:[%s5632_s3 + $0xb0] sm:$0xff]  ;;  %v1286_v49 = vld [vmem:[%s5632_s3 + $0x38] sm:$0xff] }
  0x2a   :  { %3441 = vmatprep.mubr.msk.f32.mxu1 %vm64_vm3, %v503_v5  ;;  %4020 = vmatpush3.bf16.msk.msra.mxu0 %vm4587_vm2, %v4015_v62  ;;  %v4087_v44 = vpack.c.bf16 %v1284_v43, %v1283_v41  ;;  %v2847_v45 = vld [vmem:[%s5632_s3 + $0xa8] sm:$0xff]  ;;  %v1285_v48 = vld [vmem:[%s5632_s3 + $0x30] sm:$0xff]  ;;  %v2849_v51 = vld [vmem:[%s5632_s3 + $0xb8] sm:$0xff] }
  0x2b   :  { %4030 = vmatpush3.bf16.msk.msra.mxu1 %vm4587_vm2, %v4025_v63  ;;  %4032 = vmatprep.subr.bf16.mxu0 %v4031_v6  ;;  %v4063_v47 = vpack.c.bf16 %v2848_v46, %v2847_v45  ;;  %v4091_v50 = vpack.c.bf16 %v1286_v49, %v1285_v48  ;;  %v2850_v52 = vld [vmem:[%s5632_s3 + $0xc0] sm:$0xff]  ;;  %v1288_v55 = vld [vmem:[%s5632_s3 + $0x48] sm:$0xff]  ;;  %v2852_v58 = vld [vmem:[%s5632_s3 + $0xd0] sm:$0xff] }
  0x2c   :  { %3425 = vmatmul.mubr.msk.f32.gmra.mrb[4].mxu0 %vm64_vm3, %v504_v8  ;;  %4042 = vmatprep.subr.bf16.mxu1 %v4041_v7  ;;  %v1287_v53 = vld [vmem:[%s5632_s3 + $0x40] sm:$0xff]  ;;  %v4067_v54 = vpack.c.bf16 %v2850_v52, %v2849_v51  ;;  %v2851_v57 = vld [vmem:[%s5632_s3 + $0xc8] sm:$0xff]  ;;  %v1289_v59 = vld [vmem:[%s5632_s3 + $0x50] sm:$0xff] }
  0x2d   :  { %3442 = vmatmul.mubr.msk.f32.gmra.mrb[4].mxu1 %vm64_vm3, %v504_v8  ;;  %3452 = vmatprep.mubr.msk.f32.mxu0 %vm64_vm3, %v741_v10  ;;  %v4095_v56 = vpack.c.bf16 %v1288_v55, %v1287_v53  ;;  %v4071_v60 = vpack.c.bf16 %v2852_v58, %v2851_v57  ;;  %v1290_v61 = vld [vmem:[%s5632_s3 + $0x58] sm:$0xff]  ;;  %v2854_v0 = vld [vmem:[%s5632_s3 + $0xe0] sm:$0xff]  ;;  %v1292_v3 = vld [vmem:[%s5632_s3 + $0x68] sm:$0xff] }
  0x2e   :  { %3469 = vmatprep.mubr.msk.f32.mxu1 %vm64_vm3, %v741_v10  ;;  %v4099_v62 = vpack.c.bf16 %v1290_v61, %v1289_v59  ;;  %v2853_v63 = vld [vmem:[%s5632_s3 + $0xd8] sm:$0xff]  ;;  %v1291_v1 = vld [vmem:[%s5632_s3 + $0x60] sm:$0xff]  ;;  %v2855_v5 = vld [vmem:[%s5632_s3 + $0xe8] sm:$0xff] }
  0x2f   :  { %v4075_v2 = vpack.c.bf16 %v2854_v0, %v2853_v63  ;;  %v4103_v4 = vpack.c.bf16 %v1292_v3, %v1291_v1  ;;  %v2861_v8 = vld [vmem:[%s5633_s4 + $0x80] sm:$0xff]  ;;  %v2879_v10 = vld [vmem:[%s5632_s3 + $0xf0] sm:$0xff]  ;;  %v2880_v11 = vld [vmem:[%s5632_s3 + $0xf8] sm:$0xff] }
  0x30   :  { %3453 = vmatmul.mubr.msk.f32.vlgmr.msra.gmra.mrb[0].mxu0 %vm64_vm3, %v742_v13  ;;  %v2840_v33 = vld [vmem:[%s5634_s5] ss:$0 sm:$0xff]  ;;  %v2863_v55 = vld [vmem:[%s5633_s4 + $0x90] sm:$0xff]  ;;  %v2882_v57 = vld [vmem:[%s5632_s3 + $0x108] sm:$0xff] }
  0x31   :  { %3470 = vmatmul.mubr.msk.f32.vlgmr.msra.gmra.mrb[0].mxu1 %vm64_vm3, %v742_v13  ;;  %4034 = vmatpush3.bf16.msra.mxu0 %v4031_v6  ;;  %v1293_v6 = vld [vmem:[%s5632_s3 + $0x70] sm:$0xff]  ;;  %v4987_v13 = vpack.c.bf16 %v2880_v11, %v2879_v10  ;;  %v2864_v58 = vld [vmem:[%s5633_s4 + $0x98] sm:$0xff]  ;;  %v2865_v59 = vld [vmem:[%s5633_s4 + $0xa0] sm:$0xff] }
  0x32   :  { %4044 = vmatpush3.bf16.msra.mxu1 %v4041_v7  ;;  %3455 = vmatprep.mubr.msk.f32.mxu0 %vm64_vm3, %v743_v16  ;;  %v2860_v7 = vld [vmem:[%s5633_s4 + $0x78] sm:$0xff]  ;;  %v4115_v3 = vpack.c.bf16 %v2865_v59, %v2864_v58  ;;  %v1303_v58 = vld [vmem:[%s5633_s4 + $0x48] sm:$0xff] }
  0x33   :  { %3472 = vmatprep.mubr.msk.f32.mxu1 %vm64_vm3, %v743_v16  ;;  %4037 = vmatprep.subr.msk.bf16.mxu0 %vm4587_vm2, %v4035_v17  ;;  %v4985_v12 = vpack.c.bf16 %v2861_v8, %v2860_v7  ;;  %v2884_v1 = vld [vmem:[%s5632_s3 + $0x118] sm:$0xff]  ;;  %v2885_v7 = vld [vmem:[%s5632_s3 + $0x120] sm:$0xff]  ;;  %v2886_v8 = vld [vmem:[%s5632_s3 + $0x128] sm:$0xff] }
  0x34   :  { %3456 = vmatmul.mubr.msk.f32.gmra.mrb[2].mxu0 %vm64_vm3, %v744_v19  ;;  %4047 = vmatprep.subr.msk.bf16.mxu1 %vm4587_vm2, %v4045_v18  ;;  %v4175_v11 = vpack.c.bf16 %v2886_v8, %v2885_v7  ;;  %v2921_v59 = vld [vmem:[%s5632_s3 + $0x1a8] sm:$0xff]  ;;  %v1306_v7 = vld [vmem:[%s5633_s4 + $0x60] sm:$0xff] }
  0x35   :  { %3473 = vmatmul.mubr.msk.f32.gmra.mrb[2].mxu1 %vm64_vm3, %v744_v19  ;;  %3458 = vmatprep.mubr.msk.f32.mxu0 %vm64_vm3, %v745_v20  ;;  %v1307_v8 = vld [vmem:[%s5633_s4 + $0x68] sm:$0xff] }
  0x36   :  { %3475 = vmatprep.mubr.msk.f32.mxu1 %vm64_vm3, %v745_v20  ;;  %4040 = vmatpush3.bf16.msk.msra.mxu0 %vm4587_vm2, %v4035_v17 }
  0x37   :  { %4050 = vmatpush3.bf16.msk.msra.mxu1 %vm4587_vm2, %v4045_v18  ;;  %4080 = vmatprep.subr.bf16.mxu0 %v4079_v32 }
  0x38   :  { %3459 = vmatmul.mubr.msk.f32.gmra.mrb[4].mxu0 %vm64_vm3, %v746_v21  ;;  %4052 = vmatprep.subr.bf16.mxu1 %v4051_v30 }
  0x39   :  { %3476 = vmatmul.mubr.msk.f32.gmra.mrb[4].mxu1 %vm64_vm3, %v746_v21  ;;  %3486 = vmatprep.mubr.msk.f32.mxu0 %vm64_vm3, %v983_v22 }
  0x3a   :  { %3503 = vmatprep.mubr.msk.f32.mxu1 %vm64_vm3, %v983_v22 }
  0x3c   :  { %3487 = vmatmul.mubr.msk.f32.vlgmr.msra.gmra.mrb[0].mxu0 %vm64_vm3, %v984_v23 }
  0x3d   :  { %3504 = vmatmul.mubr.msk.f32.vlgmr.msra.gmra.mrb[0].mxu1 %vm64_vm3, %v984_v23  ;;  %3489 = vmatprep.mubr.msk.f32.mxu0 %vm64_vm3, %v985_v24 }
  0x3e   :  { %3506 = vmatprep.mubr.msk.f32.mxu1 %vm64_vm3, %v985_v24  ;;  %4054 = vmatpush3.bf16.msra.mxu1 %v4051_v30 }
  0x3f   :  { %4082 = vmatpush3.bf16.msra.mxu0 %v4079_v32  ;;  %4056 = vmatprep.subr.bf16.mxu1 %v4055_v36 }
  0x40   :  { %3490 = vmatmul.mubr.msk.f32.gmra.mrb[2].mxu0 %vm64_vm3, %v986_v9  ;;  %4084 = vmatprep.subr.bf16.mxu0 %v4083_v38 }
  0x41   :  { %3507 = vmatmul.mubr.msk.f32.gmra.mrb[2].mxu1 %vm64_vm3, %v986_v9  ;;  %3492 = vmatprep.mubr.msk.f32.mxu0 %vm64_vm3, %v987_v25 }
  0x42   :  { %3509 = vmatprep.mubr.msk.f32.mxu1 %vm64_vm3, %v987_v25  ;;  %4058 = vmatpush3.bf16.msra.mxu1 %v4055_v36 }
  0x43   :  { %4086 = vmatpush3.bf16.msra.mxu0 %v4083_v38  ;;  %4060 = vmatprep.subr.bf16.mxu1 %v4059_v42 }
  0x44   :  { %3493 = vmatmul.mubr.msk.f32.gmra.mrb[4].mxu0 %vm64_vm3, %v988_v26  ;;  %4088 = vmatprep.subr.bf16.mxu0 %v4087_v44 }
  0x45   :  { %3510 = vmatmul.mubr.msk.f32.gmra.mrb[4].mxu1 %vm64_vm3, %v988_v26 }
  0x46   :  { %4062 = vmatpush3.bf16.msra.mxu1 %v4059_v42 }
  0x47   :  { %4090 = vmatpush3.bf16.msra.mxu0 %v4087_v44  ;;  %4064 = vmatprep.subr.bf16.mxu1 %v4063_v47 }
  0x48   :  { %4092 = vmatprep.subr.bf16.mxu0 %v4091_v50 }
  0x4a   :  { %4066 = vmatpush3.bf16.msra.mxu1 %v4063_v47 }
  0x4b   :  { %4094 = vmatpush3.bf16.msra.mxu0 %v4091_v50  ;;  %4068 = vmatprep.subr.bf16.mxu1 %v4067_v54 }
  0x4c   :  { %4096 = vmatprep.subr.bf16.mxu0 %v4095_v56 }
  0x4e   :  { %4070 = vmatpush3.bf16.msra.mxu1 %v4067_v54  ;;  %v2862_v54 = vld [vmem:[%s5633_s4 + $0x88] sm:$0xff] }
  0x4f   :  { %4098 = vmatpush3.bf16.msra.mxu0 %v4095_v56  ;;  %4072 = vmatprep.subr.bf16.mxu1 %v4071_v60  ;;  %v2881_v56 = vld [vmem:[%s5632_s3 + $0x100] sm:$0xff]  ;;  %v4111_v63 = vpack.c.bf16 %v2863_v55, %v2862_v54 }
  0x50   :  { %4100 = vmatprep.subr.bf16.mxu0 %v4099_v62  ;;  %v4167_v0 = vpack.c.bf16 %v2882_v57, %v2881_v56  ;;  %v2920_v54 = vld [vmem:[%s5632_s3 + $0x1a0] sm:$0xff] }
  0x51   :  { %v1302_v57 = vld [vmem:[%s5633_s4 + $0x40] sm:$0xff] }
  0x52   :  { %4074 = vmatpush3.bf16.msra.mxu1 %v4071_v60  ;;  %v2883_v60 = vld [vmem:[%s5632_s3 + $0x110] sm:$0xff] }
  0x53   :  { %4102 = vmatpush3.bf16.msra.mxu0 %v4099_v62  ;;  %4076 = vmatprep.subr.bf16.mxu1 %v4075_v2 }
  0x54   :  { %4104 = vmatprep.subr.bf16.mxu0 %v4103_v4 }
  0x56   :  { %4078 = vmatpush3.bf16.msra.mxu1 %v4075_v2 }
  0x57   :  { %4106 = vmatpush3.bf16.msra.mxu0 %v4103_v4  ;;  %3540 = vmatprep.subr.mxu1 %v2855_v5  ;;  %v4171_v4 = vpack.c.bf16 %v2884_v1, %v2883_v60  ;;  %v2922_v60 = vld [vmem:[%s5632_s3 + $0x1b0] sm:$0xff]  ;;  %v1305_v1 = vld [vmem:[%s5633_s4 + $0x58] sm:$0xff] }
  0x58   :  { %3573 = vmatprep.subr.mxu0 %v1293_v6 }
  0x5a   :  { %3541 = vmatpush3.msra.mxu1 %v2855_v5  ;;  %v2866_v5 = vld [vmem:[%s5633_s4 + $0xa8] sm:$0xff] }
  0x5b   :  { %3574 = vmatpush3.msra.mxu0 %v1293_v6  ;;  %4108 = vmatprep.subr.bf16.mxu1 %v4985_v12  ;;  %v2867_v6 = vld [vmem:[%s5633_s4 + $0xb0] sm:$0xff] }
  0x5c   :  { %4164 = vmatprep.subr.bf16.mxu0 %v4987_v13  ;;  %v4119_v10 = vpack.c.bf16 %v2867_v6, %v2866_v5 }
 0x10f   :  { %v3488_v14 = vpop.f32.mrb[0].mxu0 }
 0x110   :  { %v3505_v15 = vpop.f32.mrb[0].mxu1  ;;  %v1081_v16 = vpop.f32.mrb[1].mxu0 }
 0x111   :  { %v1226_v17 = vmax.f32 %v3488_v14, %v3505_v15  ;;  %v1190_v18 = vpop.f32.mrb[1].mxu1  ;;  %v2887_v14 = vld [vmem:[%s5632_s3 + $0x130] sm:$0xff]  ;;  %v2888_v15 = vld [vmem:[%s5632_s3 + $0x138] sm:$0xff] }
 0x112   :  { %v1225_v19 = vmax.f32 %v1081_v16, %v1190_v18  ;;  %v2870_v18 = vld [vmem:[%s5633_s4 + $0xc8] sm:$0xff] }
 0x113   :  { %1233 = vst.msk [vmem:[#allocation2 + $0x8] sm:$0xff] %vm1231_vm4, %v1226_v17  ;;  %v3491_v20 = vpop.f32.mrb[2].mxu0  ;;  %v4179_v17 = vpack.c.bf16 %v2888_v15, %v2887_v14  ;;  %v1308_v14 = vld [vmem:[%s5633_s4 + $0x70] sm:$0xff]  ;;  %v2927_v15 = vld [vmem:[%s5632_s3 + $0x1d8] sm:$0xff] }
 0x114   :  { %1232 = vst.msk [vmem:[#allocation2] sm:$0xff] %vm1231_vm4, %v1225_v19  ;;  %v3508_v21 = vpop.f32.mrb[2].mxu1  ;;  %v1091_v22 = vpop.f32.mrb[3].mxu0  ;;  %v2871_v19 = vld [vmem:[%s5633_s4 + $0xd0] sm:$0xff] }
 0x115   :  { %v1228_v23 = vmax.f32 %v3491_v20, %v3508_v21  ;;  %v1200_v24 = vpop.f32.mrb[3].mxu1  ;;  %v2889_v20 = vld [vmem:[%s5632_s3 + $0x140] sm:$0xff]  ;;  %v2890_v21 = vld [vmem:[%s5632_s3 + $0x148] sm:$0xff] }
 0x116   :  { %v1227_v9 = vmax.f32 %v1091_v22, %v1200_v24  ;;  %v4127_v22 = vpack.c.bf16 %v2871_v19, %v2870_v18  ;;  %v2872_v24 = vld [vmem:[%s5633_s4 + $0xd8] sm:$0xff]  ;;  %v2947_v18 = vld [vmem:[%s5632_s3 + $0x1e0] sm:$0xff]  ;;  %v2948_v19 = vld [vmem:[%s5632_s3 + $0x1e8] sm:$0xff] }
 0x117   :  { %1235 = vst.msk [vmem:[#allocation2 + $0x18] sm:$0xff] %vm1231_vm4, %v1228_v23  ;;  %v3494_v25 = vpop.f32.mrb[4].mxu0  ;;  %v4183_v23 = vpack.c.bf16 %v2890_v21, %v2889_v20  ;;  %v2898_v21 = vld [vmem:[%s5633_s4 + $0x100] sm:$0xff] }
 0x118   :  { %1234 = vst.msk [vmem:[#allocation2 + $0x10] sm:$0xff] %vm1231_vm4, %v1227_v9  ;;  %v3511_v26 = vpop.f32.mrb[4].mxu1  ;;  %v1101_v27 = vpop.f32.mrb[5].mxu0  ;;  %v2873_v9 = vld [vmem:[%s5633_s4 + $0xe0] sm:$0xff] }
 0x119   :  { %v1230_v28 = vmax.f32 %v3494_v25, %v3511_v26  ;;  %v1210_v29 = vpop.f32.mrb[5].mxu1  ;;  %v2891_v25 = vld [vmem:[%s5632_s3 + $0x150] sm:$0xff]  ;;  %v2892_v26 = vld [vmem:[%s5632_s3 + $0x158] sm:$0xff] }
 0x11a   :  { %v1229_v30 = vmax.f32 %v1101_v27, %v1210_v29  ;;  %v4131_v27 = vpack.c.bf16 %v2873_v9, %v2872_v24  ;;  %v2874_v29 = vld [vmem:[%s5633_s4 + $0xe8] sm:$0xff]  ;;  %v2949_v24 = vld [vmem:[%s5632_s3 + $0x1f0] sm:$0xff]  ;;  %v2950_v9 = vld [vmem:[%s5632_s3 + $0x1f8] sm:$0xff] }
 0x11b   :  { %v1238_v31 = vld [vmem:[#allocation2] ss:$2 sm:$0xff]  ;;  %v1246_v32 = vld [vmem:[#allocation2 + $0x1] ss:$2 sm:$0xff]  ;;  %1237 = vst.msk [vmem:[#allocation2 + $0x28] sm:$0xff] %vm1231_vm4, %v1230_v28  ;;  %v4187_v28 = vpack.c.bf16 %v2892_v26, %v2891_v25 }
 0x11c   :  { %v1253_v34 = vmax.f32 %v1238_v31, %v1246_v32  ;;  %1236 = vst.msk [vmem:[#allocation2 + $0x20] sm:$0xff] %vm1231_vm4, %v1229_v30  ;;  %v2893_v30 = vld [vmem:[%s5632_s3 + $0x160] sm:$0xff]  ;;  %v1295_v32 = vld [vmem:[%s5633_s4 + $0x8] sm:$0xff] }
 0x11d   :  { %v1294_v31 = vld [vmem:[%s5633_s4] sm:$0xff] }
 0x11e   :  { %v1264_v35 = vadd.f32 %v2840_v33, %v1253_v34  ;;  %v2914_v34 = vld [vmem:[%s5632_s3 + $0x170] sm:$0xff] }
 0x11f   :  { %v1240_v36 = vld [vmem:[#allocation2 + $0x10] ss:$2 sm:$0xf]  ;;  %v1248_v37 = vld [vmem:[#allocation2 + $0x11] ss:$2 sm:$0xf] }
 0x120   :  { %v1254_v38 = vmax.f32 %v1240_v36, %v1248_v37  ;;  %v1268_v39 = vmax.f32 %v1264_v35, 0.0  ;;  %v4135_v35 = vpack.c.bf16 %v1295_v32, %v1294_v31  ;;  %v1296_v36 = vld [vmem:[%s5633_s4 + $0x10] sm:$0xff] }
 0x122   :  { %v1265_v40 = vadd.f32 %v2840_v33, %v1254_v38  ;;  %v1244_v41 = vld [vmem:[#allocation2 + $0x28] ss:$2 sm:$0xf]  ;;  %v1252_v42 = vld [vmem:[#allocation2 + $0x29] ss:$2 sm:$0xf] }
 0x123   :  { %1272 = vst.msk [vmem:[#allocation3] sm:$0xff] %vm1231_vm4, %v1268_v39  ;;  %v1256_v43 = vmax.f32 %v1244_v41, %v1252_v42  ;;  %v1242_v44 = vld [vmem:[#allocation2 + $0x18] ss:$2 sm:$0xff]  ;;  %v1250_v45 = vld [vmem:[#allocation2 + $0x19] ss:$2 sm:$0xff] }
 0x124   :  { %v1255_v46 = vmax.f32 %v1242_v44, %v1250_v45  ;;  %v1269_v47 = vmax.f32 %v1265_v40, 0.0  ;;  %v1297_v38 = vld [vmem:[%s5633_s4 + $0x18] sm:$0xff]  ;;  %v2916_v40 = vld [vmem:[%s5632_s3 + $0x180] sm:$0xff]  ;;  %v1299_v45 = vld [vmem:[%s5633_s4 + $0x28] sm:$0xff] }
 0x125   :  { %v1267_v48 = vadd.f32 %v2840_v33, %v1256_v43  ;;  %v2915_v39 = vld [vmem:[%s5632_s3 + $0x178] sm:$0xff]  ;;  %v4139_v42 = vpack.c.bf16 %v1297_v38, %v1296_v36  ;;  %v1298_v44 = vld [vmem:[%s5633_s4 + $0x20] sm:$0xff] }
 0x126   :  { %v1266_v49 = vadd.f32 %v2840_v33, %v1255_v46  ;;  %1274 = vst.msk [vmem:[#allocation3 + $0x8] sm:$0xf] %vm1273_vm5, %v1269_v47  ;;  %v2913_v33 = vld [vmem:[%s5632_s3 + $0x168] sm:$0xff]  ;;  %v4223_v43 = vpack.c.bf16 %v2916_v40, %v2915_v39  ;;  %v2918_v47 = vld [vmem:[%s5632_s3 + $0x190] sm:$0xff]  ;;  %v2954_v36 = vld [vmem:[%s5632_s3 + $0x218] sm:$0xff] }
 0x127   :  { %v1271_v50 = vmax.f32 %v1267_v48, 0.0  ;;  %v4219_v37 = vpack.c.bf16 %v2914_v34, %v2913_v33  ;;  %v2917_v46 = vld [vmem:[%s5632_s3 + $0x188] sm:$0xff]  ;;  %v2902_v34 = vld [vmem:[%s5633_s4 + $0x120] sm:$0xff]  ;;  %v2904_v39 = vld [vmem:[%s5633_s4 + $0x130] sm:$0xff] }
 0x128   :  { %v1270_v51 = vmax.f32 %v1266_v49, 0.0  ;;  %v4143_v49 = vpack.c.bf16 %v1299_v45, %v1298_v44  ;;  %v2905_v40 = vld [vmem:[%s5633_s4 + $0x138] sm:$0xff] }
 0x129   :  { %1276 = vst.msk [vmem:[#allocation3 + $0x18] sm:$0xf] %vm1273_vm5, %v1271_v50  ;;  %v4227_v50 = vpack.c.bf16 %v2918_v47, %v2917_v46  ;;  %v4207_v44 = vpack.c.bf16 %v2905_v40, %v2904_v39  ;;  %v2906_v46 = vld [vmem:[%s5633_s4 + $0x140] sm:$0xff]  ;;  %v2907_v47 = vld [vmem:[%s5633_s4 + $0x148] sm:$0xff]  ;;  %v2978_v39 = vld [vmem:[%s5633_s4 + $0x250] sm:$0xff]  ;;  %v4505_v40 = vmov 0.0|0.0  }
 0x12a   :  { %v5001_v52 = vld [vmem:[#allocation3] sm:$0xff]  ;;  %1275 = vst.msk [vmem:[#allocation3 + $0x10] sm:$0xff] %vm1231_vm4, %v1270_v51 }
 0x12b   :  { %3575 = vmatprep.mubr.msk.f32.mxu0 %vm1231_vm4, %v5001_v52  ;;  %v1300_v51 = vld [vmem:[%s5633_s4 + $0x30] sm:$0xff] }
 0x12d   :  { %v1309_v53 = vld [vmem:[#allocation3 + $0x1] sm:$0xff] }
 0x12e   :  { %3542 = vmatprep.mubr.msk.f32.mxu1 %vm1231_vm4, %v1309_v53  ;;  %v5041_v2 = vld [vmem:[#allocation3 + $0x2] sm:$0xff] }
 0x12f   :  { %v5144_v48 = vld [vmem:[#allocation3 + $0x3] sm:$0xff] }
 0x130   :  { %v5246_v31 = vld [vmem:[#allocation3 + $0x4] sm:$0xff] }
 0x131   :  { %v5028_v61 = vld [vmem:[#allocation3 + $0x11] sm:$0xff] }
 0x132   :  { %v5030_v62 = vld [vmem:[#allocation3 + $0x10] sm:$0xff]  ;;  %3543 = vmatmul.mubr.msk.f32.vlgmr.msra.gmra.mrb[6].mxu1 %vm1231_vm4, %v5028_v61 }
 0x133   :  { %3576 = vmatmul.mubr.msk.f32.vlgmr.msra.gmra.mrb[6].mxu0 %vm1231_vm4, %v5030_v62  ;;  %4110 = vmatpush3.bf16.msra.mxu1 %v4985_v12  ;;  %v2868_v12 = vld [vmem:[%s5633_s4 + $0xb8] sm:$0xff]  ;;  %v5126_v41 = vld [vmem:[#allocation3 + $0x12] sm:$0xff] }
 0x134   :  { %4166 = vmatpush3.bf16.msra.mxu0 %v4987_v13  ;;  %3608 = vmatprep.mubr.msk.f32.mxu1 %vm1231_vm4, %v1309_v53  ;;  %v2869_v13 = vld [vmem:[%s5633_s4 + $0xc0] sm:$0xff]  ;;  %v1301_v53 = vld [vmem:[%s5633_s4 + $0x38] sm:$0xff] }
 0x135   :  { %3674 = vmatprep.mubr.msk.f32.mxu0 %vm1231_vm4, %v5041_v2  ;;  %4112 = vmatprep.subr.bf16.mxu1 %v4111_v63  ;;  %v4123_v16 = vpack.c.bf16 %v2869_v13, %v2868_v12  ;;  %v4147_v55 = vpack.c.bf16 %v1301_v53, %v1300_v51  ;;  %v4159_v12 = vpack.c.bf16 %v1307_v8, %v1306_v7  ;;  %v5228_v25 = vld [vmem:[#allocation3 + $0x13] sm:$0xff]  ;;  %v2935_v7 = vld [vmem:[%s5633_s4 + $0x190] sm:$0xff]  ;;  %v2936_v8 = vld [vmem:[%s5633_s4 + $0x198] sm:$0xff] }
 0x136   :  { %4168 = vmatprep.subr.bf16.mxu0 %v4167_v0  ;;  %v4211_v51 = vpack.c.bf16 %v2907_v47, %v2906_v46  ;;  %v2265_v47 = vld [vmem:[%s5636_s7 + $0x10] sm:$0xff] }
 0x137   :  { %4114 = vmatpush3.bf16.msra.mxu1 %v4111_v63  ;;  %v4235_v63 = vpack.c.bf16 %v2922_v60, %v2921_v59  ;;  %v2910_v59 = vld [vmem:[%s5633_s4 + $0x160] sm:$0xff]  ;;  %v2961_v60 = vld [vmem:[%s5632_s3 + $0x250] sm:$0xff] }
 0x138   :  { %4170 = vmatpush3.bf16.msra.mxu0 %v4167_v0  ;;  %4116 = vmatprep.subr.bf16.mxu1 %v4115_v3  ;;  %v1304_v0 = vld [vmem:[%s5633_s4 + $0x50] sm:$0xff] }
 0x139   :  { %4172 = vmatprep.subr.bf16.mxu0 %v4171_v4  ;;  %v4155_v5 = vpack.c.bf16 %v1305_v1, %v1304_v0  ;;  %v2932_v0 = vld [vmem:[%s5633_s4 + $0x178] sm:$0xff]  ;;  %v2933_v1 = vld [vmem:[%s5633_s4 + $0x180] sm:$0xff] }
 0x13b   :  { %4118 = vmatpush3.bf16.msra.mxu1 %v4115_v3  ;;  %v2923_v3 = vld [vmem:[%s5632_s3 + $0x1b8] sm:$0xff] }
 0x13c   :  { %4174 = vmatpush3.bf16.msra.mxu0 %v4171_v4  ;;  %4120 = vmatprep.subr.bf16.mxu1 %v4119_v10  ;;  %v2924_v4 = vld [vmem:[%s5632_s3 + $0x1c0] sm:$0xff] }
 0x13d   :  { %4176 = vmatprep.subr.bf16.mxu0 %v4175_v11  ;;  %v4239_v6 = vpack.c.bf16 %v2924_v4, %v2923_v3  ;;  %v4251_v4 = vpack.c.bf16 %v2933_v1, %v2932_v0 }
 0x13f   :  { %4122 = vmatpush3.bf16.msra.mxu1 %v4119_v10  ;;  %v2925_v10 = vld [vmem:[%s5632_s3 + $0x1c8] sm:$0xff] }
 0x140   :  { %4178 = vmatpush3.bf16.msra.mxu0 %v4175_v11  ;;  %4124 = vmatprep.subr.bf16.mxu1 %v4123_v16  ;;  %v2926_v11 = vld [vmem:[%s5632_s3 + $0x1d0] sm:$0xff] }
 0x141   :  { %4180 = vmatprep.subr.bf16.mxu0 %v4179_v17  ;;  %v4243_v13 = vpack.c.bf16 %v2926_v11, %v2925_v10  ;;  %v2937_v10 = vld [vmem:[%s5633_s4 + $0x1a0] sm:$0xff] }
 0x142   :  { %v4259_v11 = vpack.c.bf16 %v2937_v10, %v2936_v8 }
 0x143   :  { %4126 = vmatpush3.bf16.msra.mxu1 %v4123_v16  ;;  %v2896_v16 = vld [vmem:[%s5633_s4 + $0xf0] sm:$0xff] }
 0x144   :  { %4182 = vmatpush3.bf16.msra.mxu0 %v4179_v17  ;;  %4128 = vmatprep.subr.bf16.mxu1 %v4127_v22  ;;  %v2897_v17 = vld [vmem:[%s5633_s4 + $0xf8] sm:$0xff] }
 0x145   :  { %4184 = vmatprep.subr.bf16.mxu0 %v4183_v23  ;;  %v4191_v20 = vpack.c.bf16 %v2897_v17, %v2896_v16  ;;  %v2942_v17 = vld [vmem:[%s5633_s4 + $0x1c8] sm:$0xff] }
 0x147   :  { %4130 = vmatpush3.bf16.msra.mxu1 %v4127_v22  ;;  %v2899_v22 = vld [vmem:[%s5633_s4 + $0x108] sm:$0xff] }
 0x148   :  { %4186 = vmatpush3.bf16.msra.mxu0 %v4183_v23  ;;  %4132 = vmatprep.subr.bf16.mxu1 %v4131_v27  ;;  %v4275_v23 = vpack.c.bf16 %v2948_v19, %v2947_v18  ;;  %v4195_v26 = vpack.c.bf16 %v2899_v22, %v2898_v21  ;;  %v2943_v18 = vld [vmem:[%s5633_s4 + $0x1d0] sm:$0xff]  ;;  %v2964_v21 = vld [vmem:[%s5633_s4 + $0x1e0] sm:$0xff]  ;;  %v2965_v22 = vld [vmem:[%s5633_s4 + $0x1e8] sm:$0xff] }
 0x149   :  { %4188 = vmatprep.subr.bf16.mxu0 %v4187_v28  ;;  %v4271_v19 = vpack.c.bf16 %v2943_v18, %v2942_v17 }
 0x14b   :  { %4134 = vmatpush3.bf16.msra.mxu1 %v4131_v27  ;;  %v2900_v27 = vld [vmem:[%s5633_s4 + $0x110] sm:$0xff] }
 0x14c   :  { %4190 = vmatpush3.bf16.msra.mxu0 %v4187_v28  ;;  %3606 = vmatprep.subr.mxu1 %v2874_v29  ;;  %v2901_v28 = vld [vmem:[%s5633_s4 + $0x118] sm:$0xff] }
 0x14d   :  { %3672 = vmatprep.subr.mxu0 %v2893_v30  ;;  %v4199_v32 = vpack.c.bf16 %v2901_v28, %v2900_v27  ;;  %v2968_v27 = vld [vmem:[%s5633_s4 + $0x200] sm:$0xff]  ;;  %v2969_v28 = vld [vmem:[%s5633_s4 + $0x208] sm:$0xff] }
 0x14f   :  { %3607 = vmatpush3.msra.mxu1 %v2874_v29  ;;  %v4279_v29 = vpack.c.bf16 %v2950_v9, %v2949_v24  ;;  %v2967_v24 = vld [vmem:[%s5633_s4 + $0x1f8] sm:$0xff]  ;;  %v4303_v9 = vpack.c.bf16 %v2965_v22, %v2964_v21  ;;  %v2984_v21 = vld [vmem:[%s5636_s7 + $0x50] sm:$0xff] }
 0x150   :  { %3673 = vmatpush3.msra.mxu0 %v2893_v30  ;;  %3609 = vmatmul.mubr.msk.f32.vlgmr.msra.gmra.mrb[8].mxu1 %vm1231_vm4, %v5028_v61  ;;  %v4151_v61 = vpack.c.bf16 %v1303_v58, %v1302_v57  ;;  %v2952_v30 = vld [vmem:[%s5632_s3 + $0x208] sm:$0xff]  ;;  %v2985_v22 = vld [vmem:[%s5636_s7 + $0x58] sm:$0xff] }
 0x151   :  { %4136 = vmatprep.subr.bf16.mxu1 %v4135_v35  ;;  %3675 = vmatmul.mubr.msk.f32.vlgmr.msra.gmra.mrb[6].mxu0 %vm1231_vm4, %v5126_v41 }
 0x152   :  { %4220 = vmatprep.subr.bf16.mxu0 %v4219_v37  ;;  %4138 = vmatpush3.bf16.msra.mxu1 %v4135_v35  ;;  %v2903_v35 = vld [vmem:[%s5633_s4 + $0x128] sm:$0xff] }
 0x153   :  { %3641 = vmatprep.mubr.msk.f32.mxu1 %vm1231_vm4, %v5001_v52  ;;  %4222 = vmatpush3.bf16.msra.mxu0 %v4219_v37  ;;  %v2919_v52 = vld [vmem:[%s5632_s3 + $0x198] sm:$0xff]  ;;  %v4203_v37 = vpack.c.bf16 %v2903_v35, %v2902_v34  ;;  %v2974_v34 = vld [vmem:[%s5633_s4 + $0x230] sm:$0xff] }
 0x154   :  { %3740 = vmatprep.mubr.msk.f32.mxu0 %vm1231_vm4, %v5144_v48  ;;  %4140 = vmatprep.subr.bf16.mxu1 %v4139_v42  ;;  %v4231_v56 = vpack.c.bf16 %v2920_v54, %v2919_v52  ;;  %v2908_v52 = vld [vmem:[%s5633_s4 + $0x150] sm:$0xff]  ;;  %v2909_v54 = vld [vmem:[%s5633_s4 + $0x158] sm:$0xff] }
 0x155   :  { %4224 = vmatprep.subr.bf16.mxu0 %v4223_v43  ;;  %v4215_v57 = vpack.c.bf16 %v2909_v54, %v2908_v52  ;;  %v2975_v35 = vld [vmem:[%s5633_s4 + $0x238] sm:$0xff]  ;;  %v4507_v54 = vmov 0.0  }
 0x156   :  { %4142 = vmatpush3.bf16.msra.mxu1 %v4139_v42  ;;  %v2955_v42 = vld [vmem:[%s5632_s3 + $0x220] sm:$0xff] }
 0x157   :  { %4226 = vmatpush3.bf16.msra.mxu0 %v4223_v43  ;;  %4144 = vmatprep.subr.bf16.mxu1 %v4143_v49  ;;  %v2956_v43 = vld [vmem:[%s5632_s3 + $0x228] sm:$0xff] }
 0x158   :  { %4228 = vmatprep.subr.bf16.mxu0 %v4227_v50  ;;  %v4291_v45 = vpack.c.bf16 %v2956_v43, %v2955_v42 }
 0x15a   :  { %4146 = vmatpush3.bf16.msra.mxu1 %v4143_v49  ;;  %v2957_v49 = vld [vmem:[%s5632_s3 + $0x230] sm:$0xff] }
 0x15b   :  { %4230 = vmatpush3.bf16.msra.mxu0 %v4227_v50  ;;  %4148 = vmatprep.subr.bf16.mxu1 %v4147_v55  ;;  %v2958_v50 = vld [vmem:[%s5632_s3 + $0x238] sm:$0xff] }
 0x15c   :  { %4232 = vmatprep.subr.bf16.mxu0 %v4231_v56  ;;  %v4295_v53 = vpack.c.bf16 %v2958_v50, %v2957_v49  ;;  %v2266_v49 = vld [vmem:[%s5636_s7 + $0x18] sm:$0xff] }
 0x15d   :  { %v4335_v50 = vpack.c.bf16 %v2266_v49, %v2265_v47  ;;  %v2999_v47 = vld [vmem:[%s5636_s7 + $0xc0] sm:$0xff]  ;;  %v3000_v49 = vld [vmem:[%s5636_s7 + $0xc8] sm:$0xff] }
 0x15e   :  { %4150 = vmatpush3.bf16.msra.mxu1 %v4147_v55  ;;  %v2959_v55 = vld [vmem:[%s5632_s3 + $0x240] sm:$0xff] }
 0x15f   :  { %4234 = vmatpush3.bf16.msra.mxu0 %v4231_v56  ;;  %4152 = vmatprep.subr.bf16.mxu1 %v4151_v61  ;;  %v2960_v56 = vld [vmem:[%s5632_s3 + $0x248] sm:$0xff] }
 0x160   :  { %4236 = vmatprep.subr.bf16.mxu0 %v4235_v63  ;;  %v4299_v58 = vpack.c.bf16 %v2960_v56, %v2959_v55  ;;  %v2269_v55 = vld [vmem:[%s5636_s7 + $0x30] sm:$0xff]  ;;  %v2270_v56 = vld [vmem:[%s5636_s7 + $0x38] sm:$0xff] }
 0x162   :  { %4154 = vmatpush3.bf16.msra.mxu1 %v4151_v61  ;;  %v2930_v61 = vld [vmem:[%s5633_s4 + $0x168] sm:$0xff] }
 0x163   :  { %4238 = vmatpush3.bf16.msra.mxu0 %v4235_v63  ;;  %4156 = vmatprep.subr.bf16.mxu1 %v4155_v5  ;;  %v2931_v63 = vld [vmem:[%s5633_s4 + $0x170] sm:$0xff] }
 0x164   :  { %4240 = vmatprep.subr.bf16.mxu0 %v4239_v6  ;;  %v4247_v3 = vpack.c.bf16 %v2931_v63, %v2930_v61 }
 0x166   :  { %4158 = vmatpush3.bf16.msra.mxu1 %v4155_v5  ;;  %v5318_v5 = vld [vmem:[#allocation3 + $0x14] sm:$0xff] }
 0x167   :  { %4242 = vmatpush3.bf16.msra.mxu0 %v4239_v6  ;;  %4160 = vmatprep.subr.bf16.mxu1 %v4159_v12  ;;  %v2934_v6 = vld [vmem:[%s5633_s4 + $0x188] sm:$0xff] }
 0x168   :  { %4244 = vmatprep.subr.bf16.mxu0 %v4243_v13 }
 0x16a   :  { %4162 = vmatpush3.bf16.msra.mxu1 %v4159_v12  ;;  %v2938_v12 = vld [vmem:[%s5633_s4 + $0x1a8] sm:$0xff] }
 0x16b   :  { %4246 = vmatpush3.bf16.msra.mxu0 %v4243_v13  ;;  %3639 = vmatprep.subr.mxu1 %v1308_v14 }
 0x16c   :  { %3738 = vmatprep.subr.mxu0 %v2927_v15 }
 0x16e   :  { %3640 = vmatpush3.msra.mxu1 %v1308_v14  ;;  %v2940_v14 = vld [vmem:[%s5633_s4 + $0x1b8] sm:$0xff] }
 0x16f   :  { %3739 = vmatpush3.msra.mxu0 %v2927_v15  ;;  %3642 = vmatmul.mubr.msk.f32.vlgmr.msra.gmra.mrb[8].mxu1 %vm1231_vm4, %v5030_v62  ;;  %v2951_v62 = vld [vmem:[%s5632_s3 + $0x200] sm:$0xff] }
 0x170   :  { %4192 = vmatprep.subr.bf16.mxu1 %v4191_v20  ;;  %3741 = vmatmul.mubr.msk.f32.vlgmr.msra.gmra.mrb[6].mxu0 %vm1231_vm4, %v5228_v25  ;;  %v4283_v33 = vpack.c.bf16 %v2952_v30, %v2951_v62  ;;  %v2941_v15 = vld [vmem:[%s5633_s4 + $0x1c0] sm:$0xff]  ;;  %v2970_v62 = vld [vmem:[%s5633_s4 + $0x210] sm:$0xff]  ;;  %v2971_v30 = vld [vmem:[%s5633_s4 + $0x218] sm:$0xff] }
 0x171   :  { %4276 = vmatprep.subr.bf16.mxu0 %v4275_v23  ;;  %4194 = vmatpush3.bf16.msra.mxu1 %v4191_v20  ;;  %v4267_v16 = vpack.c.bf16 %v2941_v15, %v2940_v14  ;;  %v2944_v20 = vld [vmem:[%s5633_s4 + $0x1d8] sm:$0xff] }
 0x172   :  { %3707 = vmatprep.mubr.msk.f32.mxu1 %vm1231_vm4, %v5041_v2  ;;  %4278 = vmatpush3.bf16.msra.mxu0 %v4275_v23  ;;  %v2953_v2 = vld [vmem:[%s5632_s3 + $0x210] sm:$0xff] }
 0x173   :  { %3806 = vmatprep.mubr.msk.f32.mxu0 %vm1231_vm4, %v5246_v31  ;;  %4196 = vmatprep.subr.bf16.mxu1 %v4195_v26  ;;  %v4287_v38 = vpack.c.bf16 %v2954_v36, %v2953_v2  ;;  %v2966_v23 = vld [vmem:[%s5633_s4 + $0x1f0] sm:$0xff]  ;;  %v4323_v2 = vpack.c.bf16 %v2975_v35, %v2974_v34  ;;  %v2976_v36 = vld [vmem:[%s5633_s4 + $0x240] sm:$0xff] }
 0x174   :  { %4280 = vmatprep.subr.bf16.mxu0 %v4279_v29  ;;  %v2992_v35 = vld [vmem:[%s5636_s7 + $0x90] sm:$0xff] }
 0x175   :  { %4198 = vmatpush3.bf16.msra.mxu1 %v4195_v26  ;;  %v4307_v26 = vpack.c.bf16 %v2967_v24, %v2966_v23 }
 0x176   :  { %4282 = vmatpush3.bf16.msra.mxu0 %v4279_v29  ;;  %4200 = vmatprep.subr.bf16.mxu1 %v4199_v32  ;;  %v4311_v29 = vpack.c.bf16 %v2969_v28, %v2968_v27  ;;  %v2986_v27 = vld [vmem:[%s5636_s7 + $0x60] sm:$0xff]  ;;  %v2987_v28 = vld [vmem:[%s5636_s7 + $0x68] sm:$0xff] }
 0x177   :  { %4284 = vmatprep.subr.bf16.mxu0 %v4283_v33 }
 0x179   :  { %4202 = vmatpush3.bf16.msra.mxu1 %v4199_v32  ;;  %v4315_v32 = vpack.c.bf16 %v2971_v30, %v2970_v62  ;;  %v4350_v62 = vpack.c.bf16 %v2987_v28, %v2986_v27  ;;  %v2988_v30 = vld [vmem:[%s5636_s7 + $0x70] sm:$0xff] }
 0x17a   :  { %4286 = vmatpush3.bf16.msra.mxu0 %v4283_v33  ;;  %4204 = vmatprep.subr.bf16.mxu1 %v4203_v37 }
 0x17b   :  { %4288 = vmatprep.subr.bf16.mxu0 %v4287_v38 }
 0x17d   :  { %4206 = vmatpush3.bf16.msra.mxu1 %v4203_v37  ;;  %v2977_v37 = vld [vmem:[%s5633_s4 + $0x248] sm:$0xff] }
 0x17e   :  { %4290 = vmatpush3.bf16.msra.mxu0 %v4287_v38  ;;  %4208 = vmatprep.subr.bf16.mxu1 %v4207_v44  ;;  %v4327_v38 = vpack.c.bf16 %v2977_v37, %v2976_v36  ;;  %v2995_v37 = vld [vmem:[%s5636_s7 + $0xa0] sm:$0xff] }
 0x17f   :  { %4292 = vmatprep.subr.bf16.mxu0 %v4291_v45 }
 0x181   :  { %4210 = vmatpush3.bf16.msra.mxu1 %v4207_v44  ;;  %v2263_v44 = vld [vmem:[%s5636_s7] sm:$0xff] }
 0x182   :  { %4294 = vmatpush3.bf16.msra.mxu0 %v4291_v45  ;;  %4212 = vmatprep.subr.bf16.mxu1 %v4211_v51  ;;  %v2264_v45 = vld [vmem:[%s5636_s7 + $0x8] sm:$0xff] }
 0x183   :  { %4296 = vmatprep.subr.bf16.mxu0 %v4295_v53  ;;  %v4332_v46 = vpack.c.bf16 %v2264_v45, %v2263_v44  ;;  %v2998_v44 = vld [vmem:[%s5636_s7 + $0xb8] sm:$0xff] }
 0x185   :  { %4214 = vmatpush3.bf16.msra.mxu1 %v4211_v51  ;;  %v2267_v51 = vld [vmem:[%s5636_s7 + $0x20] sm:$0xff] }
 0x186   :  { %4298 = vmatpush3.bf16.msra.mxu0 %v4295_v53  ;;  %4216 = vmatprep.subr.bf16.mxu1 %v4215_v57  ;;  %v2268_v53 = vld [vmem:[%s5636_s7 + $0x28] sm:$0xff] }
 0x187   :  { %4300 = vmatprep.subr.bf16.mxu0 %v4299_v58  ;;  %v4338_v52 = vpack.c.bf16 %v2268_v53, %v2267_v51  ;;  %v3001_v51 = vld [vmem:[%s5636_s7 + $0xd0] sm:$0xff]  ;;  %v3002_v53 = vld [vmem:[%s5636_s7 + $0xd8] sm:$0xff] }
 0x189   :  { %4218 = vmatpush3.bf16.msra.mxu1 %v4215_v57  ;;  %v4341_v57 = vpack.c.bf16 %v2270_v56, %v2269_v55  ;;  %v3003_v55 = vld [vmem:[%s5636_s7 + $0xe0] sm:$0xff]  ;;  %v3004_v56 = vld [vmem:[%s5636_s7 + $0xe8] sm:$0xff] }
 0x18a   :  { %4302 = vmatpush3.bf16.msra.mxu0 %v4299_v58  ;;  %3705 = vmatprep.subr.mxu1 %v2910_v59  ;;  %v2271_v58 = vld [vmem:[%s5636_s7 + $0x40] sm:$0xff] }
 0x18b   :  { %3804 = vmatprep.subr.mxu0 %v2961_v60 }
 0x18d   :  { %3706 = vmatpush3.msra.mxu1 %v2910_v59  ;;  %v2272_v59 = vld [vmem:[%s5636_s7 + $0x48] sm:$0xff] }
 0x18e   :  { %3805 = vmatpush3.msra.mxu0 %v2961_v60  ;;  %3708 = vmatmul.mubr.msk.f32.vlgmr.msra.gmra.mrb[8].mxu1 %vm1231_vm4, %v5126_v41  ;;  %v4255_v41 = vpack.c.bf16 %v2935_v7, %v2934_v6  ;;  %v4344_v60 = vpack.c.bf16 %v2272_v59, %v2271_v58  ;;  %v2621_v7 = vld [vmem:[%s5638_s9 + $0x18] sm:$0xff]  ;;  %v3006_v58 = vld [vmem:[%s5636_s7 + $0xf0] sm:$0xff] }
 0x18f   :  { %4248 = vmatprep.subr.bf16.mxu1 %v4247_v3  ;;  %3807 = vmatmul.mubr.msk.f32.vlgmr.msra.gmra.mrb[6].mxu0 %vm1231_vm4, %v5318_v5  ;;  %v3007_v59 = vld [vmem:[%s5636_s7 + $0xf8] sm:$0xff] }
 0x190   :  { %4250 = vmatpush3.bf16.msra.mxu1 %v4247_v3  ;;  %3773 = vmatprep.mubr.msk.f32.mxu1 %vm1231_vm4, %v5144_v48  ;;  %v2939_v48 = vld [vmem:[%s5633_s4 + $0x1b0] sm:$0xff]  ;;  %v2618_v3 = vld [vmem:[%s5638_s9] sm:$0xff] }
 0x191   :  { %4252 = vmatprep.subr.bf16.mxu1 %v4251_v4  ;;  %v4263_v13 = vpack.c.bf16 %v2939_v48, %v2938_v12  ;;  %4331 = vmatprep.subr.bf16.mxu0 %v4505_v40  ;;  %v2981_v48 = vld [vmem:[%s5635_s6] ss:$0 sm:$0xff] }
 0x192   :  { %4333 = vmatpush3.bf16.msra.mxu0 %v4332_v46  ;;  %3862 = vmatprep.mubr.msk.f32.mxu0 %vm4506_vm6, %v4507_v54 }
 0x193   :  { %4334 = vmatprep.subr.bf16.mxu0 %v4505_v40 }
 0x194   :  { %4254 = vmatpush3.bf16.msra.mxu1 %v4251_v4  ;;  %v2619_v4 = vld [vmem:[%s5638_s9 + $0x8] sm:$0xff] }
 0x195   :  { %4256 = vmatprep.subr.bf16.mxu1 %v4255_v41  ;;  %v4392_v6 = vpack.c.bf16 %v2619_v4, %v2618_v3 }
 0x196   :  { %4336 = vmatpush3.bf16.msra.mxu0 %v4335_v50  ;;  %v4368_v50 = vpack.c.bf16 %v3000_v49, %v2999_v47 }
 0x197   :  { %4337 = vmatprep.subr.bf16.mxu0 %v4505_v40 }
 0x198   :  { %4258 = vmatpush3.bf16.msra.mxu1 %v4255_v41 }
 0x199   :  { %4260 = vmatprep.subr.bf16.mxu1 %v4259_v11 }
 0x19a   :  { %4339 = vmatpush3.bf16.msra.mxu0 %v4338_v52  ;;  %v4371_v52 = vpack.c.bf16 %v3002_v53, %v3001_v51 }
 0x19b   :  { %4340 = vmatprep.subr.bf16.mxu0 %v4505_v40 }
 0x19c   :  { %4262 = vmatpush3.bf16.msra.mxu1 %v4259_v11 }
 0x19d   :  { %4264 = vmatprep.subr.bf16.mxu1 %v4263_v13 }
 0x19e   :  { %4342 = vmatpush3.bf16.msra.mxu0 %v4341_v57  ;;  %v4374_v57 = vpack.c.bf16 %v3004_v56, %v3003_v55 }
 0x19f   :  { %4343 = vmatprep.subr.bf16.mxu0 %v4505_v40 }
 0x1a0   :  { %4266 = vmatpush3.bf16.msra.mxu1 %v4263_v13 }
 0x1a1   :  { %4268 = vmatprep.subr.bf16.mxu1 %v4267_v16 }
 0x1a2   :  { %4345 = vmatpush3.bf16.msra.mxu0 %v4344_v60 }
 0x1a3   :  { %4346 = vmatprep.subr.bf16.mxu0 %v4505_v40 }
 0x1a4   :  { %4270 = vmatpush3.bf16.msra.mxu1 %v4267_v16 }
 0x1a5   :  { %4272 = vmatprep.subr.bf16.mxu1 %v4271_v19 }
 0x1a8   :  { %4274 = vmatpush3.bf16.msra.mxu1 %v4271_v19 }
 0x1a9   :  { %3771 = vmatprep.subr.mxu1 %v2944_v20 }
 0x1ac   :  { %3772 = vmatpush3.msra.mxu1 %v2944_v20 }
 0x1ad   :  { %3774 = vmatmul.mubr.msk.f32.vlgmr.msra.gmra.mrb[8].mxu1 %vm1231_vm4, %v5228_v25  ;;  %4304 = vmatprep.subr.bf16.mxu1 %v4303_v9  ;;  %v2972_v25 = vld [vmem:[%s5633_s4 + $0x220] sm:$0xff] }
 0x1ae   :  { %4306 = vmatpush3.bf16.msra.mxu1 %v4303_v9  ;;  %3839 = vmatprep.mubr.msk.f32.mxu1 %vm1231_vm4, %v5246_v31  ;;  %v2973_v31 = vld [vmem:[%s5633_s4 + $0x228] sm:$0xff] }
 0x1af   :  { %4308 = vmatprep.subr.bf16.mxu1 %v4307_v26  ;;  %v4319_v33 = vpack.c.bf16 %v2973_v31, %v2972_v25  ;;  %v2990_v31 = vld [vmem:[%s5636_s7 + $0x80] sm:$0xff] }
 0x1b2   :  { %4310 = vmatpush3.bf16.msra.mxu1 %v4307_v26  ;;  %v4347_v26 = vpack.c.bf16 %v2985_v22, %v2984_v21 }
 0x1b3   :  { %4312 = vmatprep.subr.bf16.mxu1 %v4311_v29 }
 0x1b6   :  { %4314 = vmatpush3.bf16.msra.mxu1 %v4311_v29 }
 0x1b7   :  { %4316 = vmatprep.subr.bf16.mxu1 %v4315_v32 }
 0x1ba   :  { %4318 = vmatpush3.bf16.msra.mxu1 %v4315_v32  ;;  %v2989_v32 = vld [vmem:[%s5636_s7 + $0x78] sm:$0xff] }
 0x1bb   :  { %4320 = vmatprep.subr.bf16.mxu1 %v4319_v33  ;;  %v4353_v25 = vpack.c.bf16 %v2989_v32, %v2988_v30 }
 0x1be   :  { %4322 = vmatpush3.bf16.msra.mxu1 %v4319_v33  ;;  %v2991_v33 = vld [vmem:[%s5636_s7 + $0x88] sm:$0xff] }
 0x1bf   :  { %4324 = vmatprep.subr.bf16.mxu1 %v4323_v2  ;;  %v4356_v34 = vpack.c.bf16 %v2991_v33, %v2990_v31 }
 0x1c2   :  { %4326 = vmatpush3.bf16.msra.mxu1 %v4323_v2  ;;  %v2993_v2 = vld [vmem:[%s5636_s7 + $0x98] sm:$0xff] }
 0x1c3   :  { %4328 = vmatprep.subr.bf16.mxu1 %v4327_v38  ;;  %v4359_v36 = vpack.c.bf16 %v2993_v2, %v2992_v35 }
 0x1c6   :  { %4330 = vmatpush3.bf16.msra.mxu1 %v4327_v38  ;;  %v2996_v38 = vld [vmem:[%s5636_s7 + $0xa8] sm:$0xff] }
 0x1c7   :  { %3837 = vmatprep.subr.mxu1 %v2978_v39 }
 0x1ca   :  { %3838 = vmatpush3.msra.mxu1 %v2978_v39 }
 0x1cb   :  { %3840 = vmatmul.mubr.msk.f32.vlgmr.msra.gmra.mrb[8].mxu1 %vm1231_vm4, %v5318_v5  ;;  %4391 = vmatprep.subr.bf16.mxu1 %v4505_v40  ;;  %v2620_v5 = vld [vmem:[%s5638_s9 + $0x10] sm:$0xff] }
 0x1cc   :  { %3948 = vmatprep.mubr.msk.f32.mxu1 %vm4506_vm6, %v4507_v54  ;;  %4393 = vmatpush3.bf16.msra.mxu1 %v4392_v6  ;;  %v4395_v41 = vpack.c.bf16 %v2621_v7, %v2620_v5  ;;  %v3010_v5 = vld [vmem:[%s5636_s7 + $0x110] sm:$0xff]  ;;  %v3011_v6 = vld [vmem:[%s5636_s7 + $0x118] sm:$0xff] }
 0x1cd   :  { %4394 = vmatprep.subr.bf16.mxu1 %v4505_v40  ;;  %v4383_v7 = vpack.c.bf16 %v3011_v6, %v3010_v5 }
 0x1d0   :  { %4396 = vmatpush3.bf16.msra.mxu1 %v4395_v41  ;;  %v3012_v41 = vld [vmem:[%s5636_s7 + $0x120] sm:$0xff] }
 0x1d1   :  { %4397 = vmatprep.subr.bf16.mxu1 %v4505_v40 }
 0x205   :  { %v3544_v42 = vpop.f32.mrb[6].mxu1 }
 0x206   :  { %v1399_v43 = vpop.f32.mrb[7].mxu1 }
 0x262   :  { %v3808_v61 = vpop.f32.mrb[6].mxu0 }
 0x263   :  { %v4400_v63 = vadd.f32 %v3808_v61, %v3544_v42  ;;  %v2133_v0 = vpop.f32.mrb[7].mxu0  ;;  %v4362_v42 = vpack.c.bf16 %v2996_v38, %v2995_v37 }
 0x264   :  { %v4401_v1 = vadd.f32 %v2133_v0, %v1399_v43  ;;  %v2997_v43 = vld [vmem:[%s5636_s7 + $0xb0] sm:$0xff]  ;;  %v3008_v0 = vld [vmem:[%s5636_s7 + $0x100] sm:$0xff] }
 0x265   :  { %v4365_v46 = vpack.c.bf16 %v2998_v44, %v2997_v43 }
 0x29e   :  { %v3841_v8 = vpop.f32.mrb[8].mxu1 }
 0x29f   :  { %v2238_v10 = vmax.f32 %v4400_v63, %v3841_v8  ;;  %v2226_v11 = vpop.f32.mrb[9].mxu1  ;;  %v4377_v63 = vpack.c.bf16 %v3007_v59, %v3006_v58  ;;  %v3013_v8 = vld [vmem:[%s5636_s7 + $0x128] sm:$0xff] }
 0x2a0   :  { %v2237_v12 = vmax.f32 %v4401_v1, %v2226_v11  ;;  %v3009_v1 = vld [vmem:[%s5636_s7 + $0x108] sm:$0xff]  ;;  %v3014_v11 = vld [vmem:[%s5636_s7 + $0x130] sm:$0xff] }
 0x2a1   :  { %2241 = vst.msk [vmem:[#allocation4 + $0x8] sm:$0xff] %vm2239_vm7, %v2238_v10  ;;  %v4380_v4 = vpack.c.bf16 %v3009_v1, %v3008_v0  ;;  %v4386_v10 = vpack.c.bf16 %v3013_v8, %v3012_v41 }
 0x2a2   :  { %2240 = vst.msk [vmem:[#allocation4] sm:$0xff] %vm2239_vm7, %v2237_v12  ;;  %v3015_v12 = vld [vmem:[%s5636_s7 + $0x138] sm:$0xff] }
 0x2a8   :  { %v2244_v13 = vld [vmem:[#allocation4 + $0x8] ss:$2 sm:$0xf]  ;;  %v2248_v14 = vld [vmem:[#allocation4 + $0x9] ss:$2 sm:$0xf] }
 0x2a9   :  { %v2242_v15 = vld [vmem:[#allocation4] ss:$2 sm:$0xf]  ;;  %v2246_v16 = vld [vmem:[#allocation4 + $0x1] ss:$2 sm:$0xf]  ;;  %v2250_v17 = vmax.f32 %v2244_v13, %v2248_v14 }
 0x2aa   :  { %v2249_v18 = vmax.f32 %v2242_v15, %v2246_v16  ;;  %v2622_v16 = vld [vmem:[%s5638_s9 + $0x20] sm:$0xff] }
 0x2ab   :  { %v2259_v19 = vadd.f32 %v2981_v48, %v2250_v17  ;;  %v2623_v17 = vld [vmem:[%s5638_s9 + $0x28] sm:$0xff] }
 0x2ac   :  { %v2258_v20 = vadd.f32 %v2981_v48, %v2249_v18  ;;  %v4389_v48 = vpack.c.bf16 %v3015_v12, %v3014_v11  ;;  %v4398_v18 = vpack.c.bf16 %v2623_v17, %v2622_v16 }
 0x2ad   :  { %v5474_v23 = vmax.f32 %v2259_v19, 0.0  ;;  %v2983_v19 = vld [vmem:[%s5637_s8] ss:$0 sm:$0xff]  ;;  %s4508_s8 = smov [#allocation5]  }
 0x2ae   :  { %v5476_v24 = vmax.f32 %v2258_v20, 0.0  ;;  %4399 = vmatpush3.bf16.msra.mxu1 %v4398_v18 }
 0x2af   :  { %v2275_v9 = vrot.slane %v5474_v23, 7  ;;  %v2455_v61 = vrot.slane %v5474_v23, 1  ;;  %v2542_v14 = vrot.slane %v5474_v23, 2  ;;  %3946 = vmatprep.subr.mxu1 %v4507_v54 }
 0x2b0   :  { %v2368_v39 = vrot.slane %v5476_v24, 1  ;;  %v2454_v60 = vrot.slane %v5476_v24, 2  ;;  %v2541_v13 = vrot.slane %v5476_v24, 3 }
 0x2b1   :  { %v2277_v29 = vsel %vm2276_vm8, %v2275_v9, %v5476_v24 }
 0x2b2   :  { %3863 = vmatmul.mubr.msk.f32.vlgmr.msra.gmra.mrb[8].mxu0 %vm2239_vm7, %v2277_v29  ;;  %v2369_v45 = vsel %vm2276_vm8, %v5474_v23, %v2368_v39  ;;  %v2456_v3 = vsel %vm2276_vm8, %v2455_v61, %v2454_v60  ;;  %v2543_v15 = vsel %vm2276_vm8, %v2542_v14, %v2541_v13 }
 0x2b3   :  { %4348 = vmatpush3.bf16.msra.mxu0 %v4347_v26  ;;  %3885 = vmatprep.mubr.msk.f32.mxu0 %vm4506_vm6, %v4507_v54 }
 0x2b4   :  { %4349 = vmatprep.subr.bf16.mxu0 %v4505_v40 }
 0x2b7   :  { %4351 = vmatpush3.bf16.msra.mxu0 %v4350_v62 }
 0x2b8   :  { %4352 = vmatprep.subr.bf16.mxu0 %v4505_v40 }
 0x2bb   :  { %4354 = vmatpush3.bf16.msra.mxu0 %v4353_v25 }
 0x2bc   :  { %4355 = vmatprep.subr.bf16.mxu0 %v4505_v40 }
 0x2bf   :  { %4357 = vmatpush3.bf16.msra.mxu0 %v4356_v34 }
 0x2c0   :  { %4358 = vmatprep.subr.bf16.mxu0 %v4505_v40 }
 0x2c3   :  { %4360 = vmatpush3.bf16.msra.mxu0 %v4359_v36 }
 0x2c4   :  { %4361 = vmatprep.subr.bf16.mxu0 %v4505_v40 }
 0x2c6   :  { %3886 = vmatmul.mubr.msk.f32.vlgmr.msra.gmra.mrb[8].mxu0 %vm2239_vm7, %v2369_v45 }
 0x2c7   :  { %4363 = vmatpush3.bf16.msra.mxu0 %v4362_v42  ;;  %3908 = vmatprep.mubr.msk.f32.mxu0 %vm4506_vm6, %v4507_v54 }
 0x2c8   :  { %4364 = vmatprep.subr.bf16.mxu0 %v4505_v40 }
 0x2cb   :  { %4366 = vmatpush3.bf16.msra.mxu0 %v4365_v46 }
 0x2cc   :  { %4367 = vmatprep.subr.bf16.mxu0 %v4505_v40 }
 0x2cf   :  { %4369 = vmatpush3.bf16.msra.mxu0 %v4368_v50 }
 0x2d0   :  { %4370 = vmatprep.subr.bf16.mxu0 %v4505_v40 }
 0x2d3   :  { %4372 = vmatpush3.bf16.msra.mxu0 %v4371_v52 }
 0x2d4   :  { %4373 = vmatprep.subr.bf16.mxu0 %v4505_v40 }
 0x2d7   :  { %4375 = vmatpush3.bf16.msra.mxu0 %v4374_v57 }
 0x2d8   :  { %4376 = vmatprep.subr.bf16.mxu0 %v4505_v40 }
 0x2da   :  { %3909 = vmatmul.mubr.msk.f32.vlgmr.msra.gmra.mrb[8].mxu0 %vm2239_vm7, %v2456_v3 }
 0x2db   :  { %4378 = vmatpush3.bf16.msra.mxu0 %v4377_v63  ;;  %3931 = vmatprep.mubr.msk.f32.mxu0 %vm4506_vm6, %v4507_v54  ;;  %v3017_v54 = vld [vmem:[%s5639_s10] ss:$0 sm:$0xff] }
 0x2dc   :  { %4379 = vmatprep.subr.bf16.mxu0 %v4505_v40 }
 0x2df   :  { %4381 = vmatpush3.bf16.msra.mxu0 %v4380_v4 }
 0x2e0   :  { %4382 = vmatprep.subr.bf16.mxu0 %v4505_v40 }
 0x2e3   :  { %4384 = vmatpush3.bf16.msra.mxu0 %v4383_v7 }
 0x2e4   :  { %4385 = vmatprep.subr.bf16.mxu0 %v4505_v40 }
 0x2e7   :  { %4387 = vmatpush3.bf16.msra.mxu0 %v4386_v10 }
 0x2e8   :  { %4388 = vmatprep.subr.bf16.mxu0 %v4505_v40  ;;  %v2624_v40 = vld [vmem:[%s5638_s9 + $0x30] sm:$0x3]  ;;  %s2730_s9 = sshll.u32 %s4508_s8, 4  ;;  %s2731_s9 = int_to_ptr.vmem [resolvable:$true] %s2730_s9 }
 0x2e9   :  { %3947 = vmatpush3.msk.msra.mxu1 %vm2636_vm9, %v2624_v40  ;;  %s4480_s10 = scalar_lea.vmem %s2731_s9, 32  ;;  %p4485_p1 = scmp.lt.s32.totalorder %s2731_s9, %s2731_s9 }
 0x2ea   :  { %p4481_p0 = scmp.ne.s32.totalorder %s2731_s9, %s4480_s10  ;;  %p4486_p2 = scmp.lt.s32.totalorder %s4480_s10, %s4480_s10 }
 0x2eb   :  { %4390 = vmatpush3.bf16.msra.mxu0 %v4389_v48 }
 0x2ec   :  { %p4487_p3 = por %p4486_p2, %p4485_p1 }
 0x2ee   :  { %3932 = vmatmul.mubr.msk.f32.vlgmr.msra.gmra.mrb[8].mxu0 %vm2239_vm7, %v2543_v15  ;;  %p4488_p4 = pnand %p4487_p3, %p4481_p0 }
 0x3c1   :  { %v2612_v20 = vpop.f32.mrb[8].mxu0 }
 0x3c2   :  { %v4402_v21 = vadd.f32 %v2983_v19, %v2612_v20  ;;  %v3933_v22 = vpop.f32.mrb[9].mxu0 }
 0x3c4   :  { %v2617_v23 = vmax.f32 %v4402_v21, 0.0 }
 0x3c6   :  { %3949 = vmatmul.mubr.msk.f32.vlgmr.msra.gmra.mrb[10].mxu1 %vm2632_vm10, %v2617_v23 }
 0x499   :  { %v2706_v24 = vpop.f32.mrb[10].mxu1 }
 0x49a   :  { %v2707_v9 = vadd.f32 %v3017_v54, %v2706_v24  ;;  %v3950_v26 = vpop.f32.mrb[11].mxu1 }
 0x49c   :  { %v2711_v27 = vsel %vm2710_vm11, %v2707_v9, -inf }
 0x49d   :  { %2712 = vmax.xlane.f32.xlu0 %v2711_v27 }
 0x52a   :  { %v2713_v28 = vpop.xlane.xlu0 %2712 }
 0x52b   :  { %v2714_v29 = vsub.f32 %v2707_v9, %v2713_v28 }
 0x52d   :  { %v2715_v62 = vmul.f32 1.442695, %v2714_v29 }
 0x52f   :  { %4476 = vpow2.f32 %v2715_v62 }
 0x539   :  { %v4477_v30 = vpop.eup %4476 }
 0x53a   :  { %v2717_v32 = vsel %vm2710_vm11, %v4477_v30, 0.0 }
 0x53b   :  { %2718 = vadd.xlane.f32.xlu0 %v2717_v32 }
 0x5c8   :  { %v2719_v25 = vpop.xlane.xlu0 %2718 }
 0x5c9   :  { %4478 = vlog2.f32 %v2719_v25 }
 0x5d3   :  { %v4479_v31 = vpop.eup %4478 }
 0x5d4   :  { %v2721_v33 = vmul.f32 0.6931472, %v4479_v31 }
 0x5d6   :  { %v2722_v34 = vsub.f32 %v2714_v29, %v2721_v33 }
 0x5d8   :  { %2723 = vst.msk [vmem:[#allocation5] sm:$0x3] %vm2710_vm11, %v2722_v34 }
 0x5d9   :  { %4491 = shalt.err (!%p4488_p4)
}
 0x5da   :  { %s4492_s23 = scalar_lea.hbm %s5640_s11, 32 }
 0x5db   :  { %p4493_p5 = scmp.ne.s32.totalorder %s5640_s11, %s4492_s23  ;;  %p4496_p6 = scmp.lt.u32.totalorder %s4492_s23, %s5640_s11 }
 0x5dd   :  { %p4498_p7 = pnand %p4496_p6, %p4493_p5 }
 0x5df   :  { %4501 = shalt.err (!%p4498_p7)
}
 0x5e0   :  { %2733 = dma.vmem_to_hbm [thread:$0]  %s2731_s9, 32, %s5640_s11, [#allocation6]  }
 0x5e1   :  { %4502 = dma.done.wait [#allocation6], 32  }
 0x5e2   :  { %4503 = vsyncadd [#allocation6], 4294967264 }
 0x5e3   :  { %2737 = vsyncpa [#allocation6], 1 }

</bundles_post_ra>
